<compile_context>
chip_gen: v6e
topology: v6e:2x2x1
jax: 0.10.0
libtpu: 0.0.40
codegen_flags: <defaults>
</compile_context>

<pallas_src>
import functools

import jax
import jax.numpy as jnp
from jax.experimental import pallas as pl
from jax.experimental.pallas import tpu as pltpu

_LW = 128      # output lane width: one full vreg of lanes (unmasked stores)
_DECAY = 0.8


def _round_up(a: int, b: int) -> int:
    return ((a + b - 1) // b) * b


def _coef(T: int) -> jax.Array:
    # coef[t] = 0.8 ** (T - 1 - t)  (same as the PyTorch buffer)
    return jnp.power(jnp.float32(_DECAY),
                     jnp.arange(T - 1, -1, -1, dtype=jnp.float32))


def _coef_matrix(T: int) -> jax.Array:
    """(T*LW, LW) block-diagonal weights: Wc[l*T + t, l] = coef[t]."""
    coef = _coef(T)                                    # (T,)
    eye = jnp.eye(_LW, dtype=jnp.float32)              # (LW, LW)
    return (eye[:, None, :] * coef[None, :, None]).reshape(T * _LW, _LW)


def _membrane_kernel(x_ref, w_ref, o_ref):
    # x_ref : (BR, T*LW) f32 block in the natural time-minor layout
    # w_ref : (T*LW, LW) f32 block-diagonal coef matrix (resident, DMA'd once)
    # o_ref : (BR, LW)   f32 output block
    # The group-of-T weighted reduction is a single MXU contraction; HIGHEST
    # precision keeps full f32 accuracy.
    o_ref[...] = jnp.dot(
        x_ref[...], w_ref[...],
        precision=jax.lax.Precision.HIGHEST,
        preferred_element_type=jnp.float32,
    )


def _choose_block_rows(R: int, T: int) -> int:
    """Rows per block for the (R, T*LW) view, from a VMEM budget."""
    # Double-buffered input (BR, T*LW) + output (BR, LW), f32, plus the
    # resident coef matrix.  Keep the total comfortably under v7x's 32 MiB
    # scoped VMEM (v5e/v6e have more headroom; per-step DMAs are multi-MiB).
    coef_bytes = 2 * (T * _LW * _LW * 4)
    budget_bytes = max(4 * 1024 * 1024, 24 * 1024 * 1024 - coef_bytes)
    per_row = 2 * 4 * _LW * (T + 1)
    br = max(8, min(budget_bytes // per_row, 2048))
    br = (br // 8) * 8
    if br >= R:
        if R >= 16:
            # Keep >= 2 grid steps so v7x's second TensorCore has work.
            br = min(R, _round_up((R + 1) // 2, 8))
        else:
            br = R          # full-extent second-minor block is legal
    return br


@functools.partial(jax.jit, static_argnames=("T",))
def membrane_output_layer(x: jax.Array, T: int) -> jax.Array:
    """x: (N, C, H, W, T) -> (N, C, H, W); out = sum_t x[..., t] * 0.8**(T-1-t)."""
    assert x.shape[-1] == T
    N, C, H, W, _ = x.shape
    x = x.astype(jnp.float32)
    M = N * C * H * W

    if M < _LW:
        # Tiny problem: lane-sparse, not worth a kernel launch.
        return jnp.einsum("nchwt,t->nchw", x, _coef(T))

    Mp = _round_up(M, _LW)
    xf = x.reshape(M, T)                    # free reshape (natural layout)
    if Mp != M:
        # Ragged-M fallback only: one extra HBM pass for the pad.
        # TODO(synk): handle M % 128 != 0 with an in-kernel masked tail block
        # instead of padding.
        xf = jnp.pad(xf, ((0, Mp - M), (0, 0)))
    R = Mp // _LW
    xv = xf.reshape(R, T * _LW)             # free reshape; T stays minor

    BR = _choose_block_rows(R, T)
    grid = (pl.cdiv(R, BR),)

    out = pl.pallas_call(
        _membrane_kernel,
        out_shape=jax.ShapeDtypeStruct((R, _LW), jnp.float32),
        grid_spec=pltpu.PrefetchScalarGridSpec(
            num_scalar_prefetch=0,
            grid=grid,
            in_specs=[
                # Big lane-dense block of the natural layout: (BR, T*128).
                pl.BlockSpec((BR, T * _LW), lambda i: (i, 0)),
                # Coef matrix: block index never changes -> fetched once,
                # stays resident in VMEM across all grid steps.
                pl.BlockSpec((T * _LW, _LW), lambda i: (0, 0)),
            ],
            out_specs=pl.BlockSpec((BR, _LW), lambda i: (i, 0)),
        ),
        compiler_params=pltpu.CompilerParams(
            dimension_semantics=("parallel",),
            vmem_limit_bytes=32 * 1024 * 1024,
        ),
        cost_estimate=pl.CostEstimate(
            flops=2 * R * (T * _LW) * _LW,
            transcendentals=0,
            bytes_accessed=R * T * _LW * 4 + R * _LW * 4 + T * _LW * _LW * 4,
        ),
    )(xv, _coef_matrix(T))

    if Mp != M:
        out = out.reshape(Mp)[:M].reshape(N, C, H, W)
    else:
        out = out.reshape(N, C, H, W)
    return out


if __name__ == "__main__":
    key = jax.random.PRNGKey(0)
    N, C, H, W, T = 2, 4, 16, 16, 8
    x = jax.random.normal(key, (N, C, H, W, T), dtype=jnp.float32)

    out = membrane_output_layer(x, T)
    out = jax.block_until_ready(out)

    # Pure-JAX reference (same math as the PyTorch module, full f32).
    coef = jnp.power(jnp.float32(0.8),
                     jnp.arange(T - 1, -1, -1, dtype=jnp.float32))
    ref = jnp.sum(x * coef[None, None, None, None, :], axis=-1)

    assert out.shape == (N, C, H, W)
    assert jnp.allclose(out, ref, atol=1e-5, rtol=1e-5)
    print("KERNEL_OK")
</pallas_src>

<mosaic_0001>
module attributes {stable_mosaic.version = 11 : i64} {
  func.func @_membrane_kernel(%arg0: i32, %arg1: memref<8x1024xf32, #tpu.memory_space<vmem>>, %arg2: memref<1024x128xf32, #tpu.memory_space<vmem>>, %arg3: memref<8x128xf32, #tpu.memory_space<vmem>>) attributes {dimension_semantics = [#tpu.dimension_semantics<parallel>], iteration_bounds = array<i64: 2>, scalar_prefetch = 0 : i64, scratch_operands = 0 : i64, tpu.core_type = #tpu.core_type<tc>, window_params = [{transform_indices = @transform_0, window_bounds = array<i64: 8, 1024>}, {pipeline_mode = #tpu.pipeline_mode<synchronous>, transform_indices = @transform_1, window_bounds = array<i64: 1024, 128>}, {transform_indices = @transform_2, window_bounds = array<i64: 8, 128>}]} {
    %c0 = arith.constant 0 : index
    %c0_0 = arith.constant 0 : index
    %0 = vector.load %arg1[%c0, %c0_0] : memref<8x1024xf32, #tpu.memory_space<vmem>>, vector<8x1024xf32>
    %c0_1 = arith.constant 0 : index
    %c0_2 = arith.constant 0 : index
    %1 = vector.load %arg2[%c0_1, %c0_2] : memref<1024x128xf32, #tpu.memory_space<vmem>>, vector<1024x128xf32>
    %cst = arith.constant dense<0.000000e+00> : vector<8x128xf32>
    %2 = tpu.matmul %0, %1, %cst {dimension_numbers = #tpu.dot_dimension_numbers<[1], [0], [0], [1], [0, 0, 1, 1], [], []>, precision = #tpu.contract_precision<fp32>} : vector<8x1024xf32>, vector<1024x128xf32>, vector<8x128xf32> -> vector<8x128xf32>
    %c0_3 = arith.constant 0 : index
    %c0_4 = arith.constant 0 : index
    %3 = vector.load %arg3[%c0_3, %c0_4] : memref<8x128xf32, #tpu.memory_space<vmem>>, vector<8x128xf32>
    tpu.vector_store %arg3[%c0_3, %c0_4], %2 {strides = array<i32>} : memref<8x128xf32, #tpu.memory_space<vmem>>, vector<8x128xf32>,
    return
  }
  func.func @transform_0(%arg0: i32) -> (i32, i32) {
    %c0_i32 = arith.constant 0 : i32
    %c0_i32_0 = arith.constant 0 : i32
    return %arg0, %c0_i32 : i32, i32
  }
  func.func @transform_1(%arg0: i32) -> (i32, i32) {
    %c0_i32 = arith.constant 0 : i32
    %c0_i32_0 = arith.constant 0 : i32
    %c0_i32_1 = arith.constant 0 : i32
    return %c0_i32, %c0_i32_0 : i32, i32
  }
  func.func @transform_2(%arg0: i32) -> (i32, i32) {
    %c0_i32 = arith.constant 0 : i32
    %c0_i32_0 = arith.constant 0 : i32
    return %arg0, %c0_i32 : i32, i32
  }
}

</mosaic_0001>

<bundles_post_ra>
// kernel: membrane_output_layer.1
= control target key start
LH: loop header
LB: loop body
LE: loop exit
PB: predicated region body
PF: predicated region fallthrough
CT: control target
= control target key end

     0   :  { %s4662_s9 = smov 0   ;;  %s7416_s0 = inlined_call_operand.vmem [shape: f32[16,1024], index: 0, kind: input, shape index: {}]   ;;  %s7417_s1 = inlined_call_operand.vmem [shape: f32[1024,128], index: 1, kind: input, shape index: {}]   ;;  %s7418_s2 = inlined_call_operand.vmem [shape: f32[16,128], index: 2, kind: output, shape index: {}]  }
   0x1 LB: > { %s3780_s10 = sadd.s32 4294967295, %s4645_s9   ;;  %p3784_p0 = scmp.ge.s32.totalorder %s4645_s9, 1  ;;  %s4645_s9 = sphi %s4662_s9, %s12_s9  }
   0x2   : > { %p112_p1 = scmp.lt.s32.totalorder %s4645_s9, 3 }
   0x4   : > { %p113_p2 = pnand %p3784_p0, %p112_p1 }
   0x6   : > { %116 = sbr.rel (%p113_p2) target bundleno = 637 (0x27d), region = 28 }
   0xb   : > { %v181_v0 = vld [vmem:[%s7417_s1 + $0xf8] sm:$0xff]  ;;  %v180_v2 = vld [vmem:[%s7417_s1 + $0xf0] sm:$0xff]  ;;  %v179_v7 = vld [vmem:[%s7417_s1 + $0xe8] sm:$0xff]  ;;  %p4892_p3 = scmp.lt.s32.totalorder %s3780_s10, 1 }
   0xc   : > { %v165_v1 = vld [vmem:[%s7417_s1 + $0x78] sm:$0xff]  ;;  %v4679_v3 = vand.u32 4294901760, %v181_v0  ;;  %v4683_v5 = vand.u32 4294901760, %v180_v2  ;;  %v164_v6 = vld [vmem:[%s7417_s1 + $0x70] sm:$0xff]  ;;  %v163_v8 = vld [vmem:[%s7417_s1 + $0x68] sm:$0xff]  ;;  %v4696_v10 = vand.u32 4294901760, %v179_v7 }
   0xd   : > { %v4681_v4 = vand.u32 4294901760, %v165_v1  ;;  %v4694_v9 = vand.u32 4294901760, %v164_v6  ;;  %v4698_v11 = vand.u32 4294901760, %v163_v8  ;;  %v178_v12 = vld [vmem:[%s7417_s1 + $0xe0] sm:$0xff]  ;;  %v177_v14 = vld [vmem:[%s7417_s1 + $0xd8] sm:$0xff]  ;;  %v4727_v20 = vld [vmem:[%s7417_s1 + $0xd0] sm:$0xff] }
   0xe   : > { %v162_v13 = vld [vmem:[%s7417_s1 + $0x60] sm:$0xff]  ;;  %3791 = vmatprep.subr.mxu0 %v4679_v3  ;;  %v4710_v15 = vand.u32 4294901760, %v178_v12  ;;  %v4714_v17 = vand.u32 4294901760, %v177_v14  ;;  %v4717_v18 = vsub.f32 %v181_v0, %v4679_v3  ;;  %v4722_v19 = vld [vmem:[%s7417_s1 + $0x58] sm:$0xff]  ;;  %v4732_v21 = vld [vmem:[%s7417_s1 + $0x50] sm:$0xff]  ;;  %v4742_v24 = vand.u32 4294901760, %v4727_v20 }
   0xf   : > { %v4712_v16 = vand.u32 4294901760, %v162_v13  ;;  %3792 = vmatpush3.msra.mxu0 %v4681_v4  ;;  %v4736_v22 = vand.u32 4294901760, %v4722_v19  ;;  %v4739_v23 = vsub.f32 %v165_v1, %v4681_v4  ;;  %v4745_v25 = vsub.f32 %v180_v2, %v4683_v5  ;;  %v4750_v26 = vld [vmem:[%s7417_s1 + $0xc8] sm:$0xff]  ;;  %v4760_v28 = vld [vmem:[%s7417_s1 + $0xc0] sm:$0xff]  ;;  %v4812_v46 = vld [vmem:[%s7417_s1 + $0xb8] sm:$0xff]  ;;  %s8141_s10 = smov (!%p4892_p3, %s3780_s10), 1 }
  0x10   : > { %7691 = vst [vmem:[#allocation2_spill] sm:$0xff] %v4742_v24  ;;  %v4755_v27 = vld [vmem:[%s7417_s1 + $0x48] sm:$0xff]  ;;  %3793 = vmatprep.subr.mxu0 %v4683_v5  ;;  %v7432_v29 = vand.u32 4294901760, %v4717_v18  ;;  %v4765_v30 = vand.u32 4294901760, %v4732_v21  ;;  %v4768_v31 = vsub.f32 %v164_v6, %v4694_v9  ;;  %v4771_v32 = vand.u32 4294901760, %v4750_v26  ;;  %v4785_v37 = vld [vmem:[%s7417_s1 + $0x40] sm:$0xff] }
  0x11   : > { %3794 = vmatpush3.msra.mxu0 %v4694_v9  ;;  %v7431_v33 = vand.u32 4294901760, %v4739_v23  ;;  %v7429_v34 = vand.u32 4294901760, %v4745_v25  ;;  %v4777_v35 = vsub.f32 %v179_v7, %v4696_v10  ;;  %v4780_v36 = vand.u32 4294901760, %v4755_v27  ;;  %v4825_v51 = vld [vmem:[%s7417_s1 + $0x38] sm:$0xff]  ;;  %v4835_v56 = vld [vmem:[%s7417_s1 + $0xb0] sm:$0xff]  ;;  %v4865_v2 = vld [vmem:[%s7417_s1 + $0xa8] sm:$0xff] }
  0x12   : > { %7692 = vst [vmem:[#allocation3_spill] sm:$0xff] %v4765_v30  ;;  %7693 = vst [vmem:[#allocation4_spill] sm:$0xff] %v4771_v32  ;;  %3795 = vmatprep.subr.mxu0 %v4696_v10  ;;  %v506_v38 = vsub.f32 %v4717_v18, %v7432_v29  ;;  %v7428_v39 = vand.u32 4294901760, %v4768_v31  ;;  %v4793_v40 = vsub.f32 %v163_v8, %v4698_v11  ;;  %v4796_v41 = vand.u32 4294901760, %v4760_v28  ;;  %v4850_v61 = vld [vmem:[%s7417_s1 + $0x30] sm:$0xff]  ;;  %s3790_s18 = sshll.u32 %s8141_s10, 6 }
  0x13   : > { %7694 = vst [vmem:[#allocation5_spill] sm:$0xff] %v4780_v36  ;;  %3796 = vmatpush3.msra.mxu0 %v4698_v11  ;;  %v394_v42 = vsub.f32 %v4739_v23, %v7431_v33  ;;  %v513_v43 = vsub.f32 %v4745_v25, %v7429_v34  ;;  %v7426_v44 = vand.u32 4294901760, %v4777_v35  ;;  %v4807_v45 = vsub.f32 %v178_v12, %v4710_v15  ;;  %v5013_v33 = vld [vmem:[%s7417_s1 + $0x88] sm:$0xff]  ;;  %s5061_s25 = scalar_lea.vmem %s7416_s0, %s3790_s18  ;;  %s3787_s18 = sshll.u32 %s8141_s10, 3 }
  0x14   : > { %7695 = vst [vmem:[#allocation6_spill] sm:$0xff] %v4796_v41  ;;  %3797 = vmatprep.subr.mxu0 %v4710_v15  ;;  %v507_v47 = vand.u32 4294901760, %v506_v38  ;;  %v401_v48 = vsub.f32 %v4768_v31, %v7428_v39  ;;  %v7424_v49 = vand.u32 4294901760, %v4793_v40  ;;  %v4820_v50 = vand.u32 4294901760, %v4785_v37  ;;  %s141_s21 = scalar_lea.vmem %s7418_s2, %s3787_s18 }
  0x15   : > { %3798 = vmatpush3.msra.mxu0 %v4712_v16  ;;  %v395_v52 = vand.u32 4294901760, %v394_v42  ;;  %v514_v53 = vand.u32 4294901760, %v513_v43  ;;  %v520_v54 = vsub.f32 %v4777_v35, %v7426_v44  ;;  %v7423_v55 = vand.u32 4294901760, %v4807_v45  ;;  %v4986_v44 = vld [vmem:[%s7417_s1 + $0x90] sm:$0xff] }
  0x16   : > { %7696 = vst [vmem:[#allocation7_spill] sm:$0xff] %v4820_v50  ;;  %3799 = vmatprep.subr.mxu0 %v4714_v17  ;;  %3826 = vmatprep.subr.mxu1 %v507_v47  ;;  %v402_v57 = vand.u32 4294901760, %v401_v48  ;;  %v408_v58 = vsub.f32 %v4793_v40, %v7424_v49  ;;  %v4842_v59 = vsub.f32 %v162_v13, %v4712_v16  ;;  %v4845_v60 = vand.u32 4294901760, %v4812_v46  ;;  %v4879_v13 = vld [vmem:[%s7417_s1 + $0x28] sm:$0xff]  ;;  %v4970_v49 = vld [vmem:[%s7417_s1 + $0x18] sm:$0xff] }
  0x17   : > { %3800 = vmatpush3.msra.mxu0 %v4736_v22  ;;  %3827 = vmatpush3.msra.mxu1 %v395_v52  ;;  %v521_v62 = vand.u32 4294901760, %v520_v54  ;;  %v527_v63 = vsub.f32 %v4807_v45, %v7423_v55  ;;  %v4857_v0 = vsub.f32 %v177_v14, %v4714_v17  ;;  %v4860_v1 = vand.u32 4294901760, %v4825_v51  ;;  %v4911_v52 = vld [vmem:[%s7417_s1 + $0xa0] sm:$0xff] }
  0x18   : > { %7697 = vst [vmem:[#allocation8_spill] sm:$0xff] %v4845_v60  ;;  %3801 = vmatprep.subr.mxu0 %v4742_v24  ;;  %3828 = vmatprep.subr.mxu1 %v514_v53  ;;  %v409_v6 = vand.u32 4294901760, %v408_v58  ;;  %v7422_v7 = vand.u32 4294901760, %v4842_v59  ;;  %v4871_v8 = vsub.f32 %v4722_v19, %v4736_v22  ;;  %v4874_v12 = vand.u32 4294901760, %v4835_v56 }
  0x19   : > { %7698 = vst [vmem:[#allocation9_spill] sm:$0xff] %v4860_v1  ;;  %3802 = vmatpush3.msra.mxu0 %v4765_v30  ;;  %3829 = vmatpush3.msra.mxu1 %v402_v57  ;;  %v528_v14 = vand.u32 4294901760, %v527_v63  ;;  %v7419_v38 = vand.u32 4294901760, %v4857_v0  ;;  %v4885_v42 = vsub.f32 %v4727_v20, %v4742_v24  ;;  %v4888_v19 = vand.u32 4294901760, %v4850_v61 }
  0x1a   : > { %7699 = vst [vmem:[#allocation10_spill] sm:$0xff] %v4874_v12  ;;  %3803 = vmatprep.subr.mxu0 %v4771_v32  ;;  %3830 = vmatprep.subr.mxu1 %v521_v62  ;;  %v415_v43 = vsub.f32 %v4842_v59, %v7422_v7  ;;  %v7420_v47 = vand.u32 4294901760, %v4871_v8  ;;  %v4903_v20 = vsub.f32 %v4732_v21, %v4765_v30  ;;  %v4906_v48 = vand.u32 4294901760, %v4865_v2 }
  0x1b   : > { %7700 = vst [vmem:[#allocation11_spill] sm:$0xff] %v4888_v19  ;;  %3804 = vmatpush3.msra.mxu0 %v4780_v36  ;;  %3831 = vmatpush3.msra.mxu1 %v409_v6  ;;  %v534_v53 = vsub.f32 %v4857_v0, %v7419_v38  ;;  %v7421_v54 = vand.u32 4294901760, %v4885_v42  ;;  %v4920_v21 = vsub.f32 %v4750_v26, %v4771_v32  ;;  %v4923_v57 = vand.u32 4294901760, %v4879_v13  ;;  %v4937_v26 = vld [vmem:[%s7417_s1 + $0x20] sm:$0xff] }
  0x1c   : > { %7702 = vst [vmem:[#allocation12_spill] sm:$0xff] %v4906_v48  ;;  %3805 = vmatprep.subr.mxu0 %v4796_v41  ;;  %3832 = vmatprep.subr.mxu1 %v528_v14  ;;  %v416_v58 = vand.u32 4294901760, %v415_v43  ;;  %v422_v62 = vsub.f32 %v4871_v8, %v7420_v47  ;;  %v7425_v63 = vand.u32 4294901760, %v4903_v20  ;;  %v4932_v6 = vsub.f32 %v4755_v27, %v4780_v36  ;;  %v4950_v27 = vld [vmem:[%s7417_s1 + $0x98] sm:$0xff] }
  0x1d   : > { %7703 = vst [vmem:[#allocation13_spill] sm:$0xff] %v4923_v57  ;;  %3806 = vmatpush3.msra.mxu0 %v4820_v50  ;;  %v535_v38 = vand.u32 4294901760, %v534_v53  ;;  %v541_v14 = vsub.f32 %v4885_v42, %v7421_v54  ;;  %v7427_v43 = vand.u32 4294901760, %v4920_v21  ;;  %v4945_v47 = vand.u32 4294901760, %v4911_v52 }
  0x1e   : > { %3833 = vmatpush3.msra.mxu1 %v416_v58  ;;  %3807 = vmatprep.subr.mxu0 %v4845_v60  ;;  %v423_v53 = vand.u32 4294901760, %v422_v62  ;;  %v429_v54 = vsub.f32 %v4903_v20, %v7425_v63  ;;  %v7430_v7 = vand.u32 4294901760, %v4932_v6  ;;  %v4965_v55 = vsub.f32 %v4760_v28, %v4796_v41 }
  0x1f   : > { %7704 = vst [vmem:[#allocation14_spill] sm:$0xff] %v4945_v47  ;;  %3834 = vmatprep.subr.mxu1 %v535_v38  ;;  %3808 = vmatpush3.msra.mxu0 %v4860_v1  ;;  %v542_v58 = vand.u32 4294901760, %v541_v14  ;;  %v548_v62 = vsub.f32 %v4920_v21, %v7427_v43  ;;  %v4977_v63 = vand.u32 4294901760, %v4937_v26  ;;  %v4981_v28 = vsub.f32 %v4785_v37, %v4820_v50  ;;  %v4999_v37 = vld [vmem:[%s7417_s1 + $0x10] sm:$0xff] }
  0x20   : > { %3835 = vmatpush3.msra.mxu1 %v423_v53  ;;  %3809 = vmatprep.subr.mxu0 %v4874_v12  ;;  %v430_v38 = vand.u32 4294901760, %v429_v54  ;;  %v436_v14 = vsub.f32 %v4932_v6, %v7430_v7  ;;  %v7435_v43 = vand.u32 4294901760, %v4965_v55  ;;  %v4994_v39 = vand.u32 4294901760, %v4950_v27 }
  0x21   : > { %7705 = vst [vmem:[#allocation15_spill] sm:$0xff] %v4977_v63  ;;  %3836 = vmatprep.subr.mxu1 %v542_v58  ;;  %3810 = vmatpush3.msra.mxu0 %v4888_v19  ;;  %v549_v53 = vand.u32 4294901760, %v548_v62  ;;  %v7436_v54 = vand.u32 4294901760, %v4981_v28  ;;  %v5005_v34 = vsub.f32 %v4812_v46, %v4845_v60  ;;  %v5008_v7 = vand.u32 4294901760, %v4970_v49 }
  0x22   : > { %3837 = vmatpush3.msra.mxu1 %v430_v38  ;;  %3811 = vmatprep.subr.mxu0 %v4906_v48  ;;  %v437_v58 = vand.u32 4294901760, %v436_v14  ;;  %v555_v62 = vsub.f32 %v4965_v55, %v7435_v43  ;;  %v5022_v46 = vsub.f32 %v4825_v51, %v4860_v1  ;;  %v5025_v29 = vand.u32 4294901760, %v4986_v44  ;;  %v5042_v51 = vld [vmem:[%s7417_s1 + $0x8] sm:$0xff] }
  0x23   : > { %7706 = vst [vmem:[#allocation16_spill] sm:$0xff] %v5008_v7  ;;  %3838 = vmatprep.subr.mxu1 %v549_v53  ;;  %3812 = vmatpush3.msra.mxu0 %v4923_v57  ;;  %v443_v38 = vsub.f32 %v4981_v28, %v7436_v54  ;;  %v5034_v60 = vsub.f32 %v4835_v56, %v4874_v12  ;;  %v5037_v43 = vand.u32 4294901760, %v4999_v37  ;;  %v5051_v56 = vand.u32 4294901760, %v5013_v33  ;;  %v5056_v12 = vld [vmem:[%s7417_s1 + $0x80] sm:$0xff] }
  0x24   : > { %7707 = vst [vmem:[#allocation17_spill] sm:$0xff] %v5025_v29  ;;  %3839 = vmatpush3.msra.mxu1 %v437_v58  ;;  %3813 = vmatprep.subr.mxu0 %v4945_v47  ;;  %v556_v53 = vand.u32 4294901760, %v555_v62  ;;  %v5048_v14 = vsub.f32 %v4850_v61, %v4888_v19  ;;  %v7710_v62 = vand.u32 4294901760, %v5005_v34  ;;  %v5070_v19 = vsub.f32 %v4865_v2, %v4906_v48  ;;  %v5087_v2 = vld [vmem:[%s7417_s1] sm:$0xff] }
  0x25   : > { %7708 = vst [vmem:[#allocation18_spill] sm:$0xff] %v5037_v43  ;;  %7709 = vst [vmem:[#allocation19_spill] sm:$0xff] %v5051_v56  ;;  %3814 = vmatpush3.msra.mxu0 %v4977_v63  ;;  %v444_v58 = vand.u32 4294901760, %v443_v38  ;;  %v7455_v54 = vand.u32 4294901760, %v5034_v60  ;;  %v7712_v1 = vand.u32 4294901760, %v5022_v46  ;;  %v5078_v41 = vand.u32 4294901760, %v5042_v51 }
  0x26   : > { %v562_v61 = vsub.f32 %v5005_v34, %v7710_v62  ;;  %7711 = vst [vmem:[#allocation20_spill] sm:$0xff] %v5070_v19  ;;  %3840 = vmatprep.subr.mxu1 %v556_v53  ;;  %3815 = vmatprep.subr.mxu0 %v4994_v39  ;;  %v5082_v62 = vsub.f32 %v4879_v13, %v4923_v57  ;;  %v5095_v48 = vand.u32 4294901760, %v5056_v12  ;;  %v143_v13 = vld [vmem:[%s5061_s25 + $0x8] sm:$0xff]  ;;  %v7713_v36 = vand.u32 4294901760, %v5048_v14 }
  0x27   : > { %v450_v50 = vsub.f32 %v5022_v46, %v7712_v1  ;;  %3841 = vmatpush3.msra.mxu1 %v444_v58  ;;  %3816 = vmatpush3.msra.mxu0 %v5008_v7  ;;  %v569_v1 = vsub.f32 %v5034_v60, %v7455_v54  ;;  %v5105_v32 = vsub.f32 %v4911_v52, %v4945_v47  ;;  %v142_v54 = vld [vmem:[%s5061_s25] sm:$0xff]  ;;  %v7714_v30 = vand.u32 4294901760, %v5070_v19 }
  0x28   : > { %v563_v53 = vand.u32 4294901760, %v562_v61  ;;  %3817 = vmatprep.subr.mxu0 %v5025_v29  ;;  %v457_v58 = vsub.f32 %v5048_v14, %v7713_v36  ;;  %v5113_v24 = vand.u32 4294901760, %v5087_v2  ;;  %v5117_v36 = vsub.f32 %v4937_v26, %v4977_v63 }
  0x29   : > { %v451_v57 = vand.u32 4294901760, %v450_v50  ;;  %v570_v38 = vand.u32 4294901760, %v569_v1  ;;  %3818 = vmatpush3.msra.mxu0 %v5037_v43  ;;  %v576_v50 = vsub.f32 %v5070_v19, %v7714_v30  ;;  %v7715_v52 = vand.u32 4294901760, %v5082_v62 }
  0x2a   : > { %3842 = vmatprep.subr.mxu1 %v563_v53  ;;  %v458_v61 = vand.u32 4294901760, %v457_v58  ;;  %3819 = vmatprep.subr.mxu0 %v5051_v56  ;;  %v7464_v1 = vand.u32 4294901760, %v5105_v32  ;;  %v5124_v47 = vand.u32 4294901760, %v143_v13  ;;  %v7465_v19 = vand.u32 4294901760, %v5117_v36 }
  0x2b   : > { %3843 = vmatpush3.msra.mxu1 %v451_v57  ;;  %v464_v53 = vsub.f32 %v5082_v62, %v7715_v52  ;;  %v577_v30 = vand.u32 4294901760, %v576_v50  ;;  %3820 = vmatpush3.msra.mxu0 %v5078_v41  ;;  %v5130_v57 = vsub.f32 %v4950_v27, %v4994_v39  ;;  %v5132_v26 = vand.u32 4294901760, %v142_v54 }
  0x2c   : > { %7716 = vst [vmem:[#allocation21_spill] sm:$0xff] %v5124_v47  ;;  %3844 = vmatprep.subr.mxu1 %v570_v38  ;;  %3821 = vmatprep.subr.mxu0 %v5095_v48  ;;  %v583_v52 = vsub.f32 %v5105_v32, %v7464_v1  ;;  %v5139_v38 = vsub.f32 %v143_v13, %v5124_v47 }
  0x2d   : > { %7717 = vst [vmem:[#allocation22_spill] sm:$0xff] %v5132_v26  ;;  %3845 = vmatpush3.msra.mxu1 %v458_v61  ;;  %v465_v58 = vand.u32 4294901760, %v464_v53  ;;  %v5143_v50 = vsub.f32 %v4970_v49, %v5008_v7  ;;  %3822 = vmatpush3.msra.mxu0 %v5113_v24  ;;  %v471_v27 = vsub.f32 %v5117_v36, %v7465_v19 }
  0x2e   : > { %3846 = vmatprep.subr.mxu1 %v577_v30  ;;  %v5151_v53 = vsub.f32 %v142_v54, %v5132_v26  ;;  %v5155_v13 = vsub.f32 %v4986_v44, %v5025_v29  ;;  %v584_v1 = vand.u32 4294901760, %v583_v52  ;;  %v7470_v49 = vand.u32 4294901760, %v5139_v38  ;;  %3861 = vmatprep.subr.mxu0 %v4717_v18 }
  0x2f   : > { %3847 = vmatpush3.msra.mxu1 %v465_v58  ;;  %v7473_v30 = vand.u32 4294901760, %v5143_v50  ;;  %v5162_v19 = vsub.f32 %v4999_v37, %v5037_v43  ;;  %v472_v61 = vand.u32 4294901760, %v471_v27  ;;  %v7718_v54 = vand.u32 4294901760, %v5130_v57  ;;  %615 = vmatprep.mubr.f32.mxu1 %v5124_v47 }
  0x30   : > { %3848 = vmatprep.subr.mxu1 %v584_v1  ;;  %v377_v52 = vsub.f32 %v5139_v38, %v7470_v49  ;;  %v7719_v58 = vand.u32 4294901760, %v5151_v53  ;;  %v7720_v47 = vand.u32 4294901760, %v5155_v13  ;;  %v5189_v43 = vsub.f32 %v5042_v51, %v5078_v41 }
  0x31   : > { %v590_v7 = vsub.f32 %v5130_v57, %v7718_v54  ;;  %v478_v37 = vsub.f32 %v5143_v50, %v7473_v30  ;;  %v5179_v54 = vsub.f32 %v5013_v33, %v5051_v56  ;;  %3849 = vmatpush3.msra.mxu1 %v472_v61  ;;  %v7722_v29 = vand.u32 4294901760, %v5162_v19 }
  0x32   : > { %v383_v1 = vsub.f32 %v5151_v53, %v7719_v58  ;;  %v597_v49 = vsub.f32 %v5155_v13, %v7720_v47  ;;  %7721 = vst [vmem:[#allocation23_spill] sm:$0xff] %v5189_v43  ;;  %v378_v30 = vand.u32 4294901760, %v377_v52  ;;  %v7480_v58 = vand.u32 4294901760, %v5189_v43 }
  0x33   : > { %v591_v44 = vand.u32 4294901760, %v590_v7  ;;  %v479_v27 = vand.u32 4294901760, %v478_v37  ;;  %v485_v33 = vsub.f32 %v5162_v19, %v7722_v29  ;;  %v7481_v7 = vand.u32 4294901760, %v5179_v54 }
  0x34   : > { %v384_v61 = vand.u32 4294901760, %v383_v1  ;;  %v598_v56 = vand.u32 4294901760, %v597_v49  ;;  %v5198_v47 = vsub.f32 %v5056_v12, %v5095_v48  ;;  %379 = vmatprep.mubr.f32.mxu0 %v378_v30  ;;  %v5205_v29 = vsub.f32 %v5087_v2, %v5113_v24 }
  0x35   : > { %3850 = vmatprep.subr.mxu1 %v591_v44  ;;  %v486_v51 = vand.u32 4294901760, %v485_v33  ;;  %v604_v52 = vsub.f32 %v5179_v54, %v7481_v7  ;;  %v492_v49 = vsub.f32 %v5189_v43, %v7480_v58  ;;  %v7725_v33 = vld [vmem:[#allocation2_spill] sm:$0xff]  ;;  %v7739_v7 = vand.u32 4294901760, %v4717_v18 }
  0x36   : > { %7723 = vst [vmem:[#allocation24_spill] sm:$0xff] %v5198_v47  ;;  %3851 = vmatpush3.msra.mxu1 %v479_v27  ;;  %7724 = vst [vmem:[#allocation25_spill] sm:$0xff] %v5205_v29  ;;  %385 = vmatmul.mubr.f32.vlgmr.msra.gmra.mxu0 %v384_v61  ;;  %v7479_v12 = vand.u32 4294901760, %v5198_v47  ;;  %v7478_v44 = vand.u32 4294901760, %v5205_v29  ;;  %v7726_v61 = vld [vmem:[#allocation3_spill] sm:$0xff]  ;;  %v7738_v58 = vld [vmem:[#allocation14_spill] sm:$0xff] }
  0x37   : > { %3852 = vmatprep.subr.mxu1 %v598_v56  ;;  %3862 = vmatpush3.msra.mxu0 %v4739_v23  ;;  %v605_v30 = vand.u32 4294901760, %v604_v52  ;;  %v493_v37 = vand.u32 4294901760, %v492_v49  ;;  %v7728_v52 = vld [vmem:[#allocation4_spill] sm:$0xff]  ;;  %v7729_v49 = vld [vmem:[#allocation5_spill] sm:$0xff]  ;;  %v7747_v18 = vand.u32 4294901760, %v4777_v35 }
  0x38   : > { %3853 = vmatpush3.msra.mxu1 %v486_v51  ;;  %3863 = vmatprep.subr.mxu0 %v4745_v25  ;;  %v611_v2 = vsub.f32 %v5198_v47, %v7479_v12  ;;  %v499_v56 = vsub.f32 %v5205_v29, %v7478_v44  ;;  %v7727_v51 = vld [vmem:[#allocation20_spill] sm:$0xff]  ;;  %v7737_v12 = vld [vmem:[#allocation13_spill] sm:$0xff] }
  0x39   : > { %752 = vmatprep.mubr.f32.mxu0 %v5139_v38  ;;  %3864 = vmatpush3.msra.mxu0 %v4768_v31  ;;  %v7736_v44 = vld [vmem:[#allocation12_spill] sm:$0xff] }
  0x3a   : > { %3854 = vmatprep.subr.mxu1 %v605_v30  ;;  %3865 = vmatprep.subr.mxu0 %v4777_v35  ;;  %v612_v27 = vand.u32 4294901760, %v611_v2  ;;  %v500_v1 = vand.u32 4294901760, %v499_v56  ;;  %v7730_v30 = vld [vmem:[#allocation6_spill] sm:$0xff]  ;;  %v7732_v2 = vld [vmem:[#allocation8_spill] sm:$0xff]  ;;  %v7733_v56 = vld [vmem:[#allocation9_spill] sm:$0xff]  ;;  %v7752_v35 = vand.u32 4294901760, %v5151_v53 }
  0x3b   : > { %3855 = vmatpush3.msra.mxu1 %v493_v37  ;;  %3866 = vmatpush3.msra.mxu0 %v4793_v40  ;;  %v7731_v37 = vld [vmem:[#allocation7_spill] sm:$0xff] }
  0x3c   : > { %3856 = vmatprep.subr.mxu1 %v612_v27  ;;  %3867 = vmatprep.subr.mxu0 %v4807_v45  ;;  %v7734_v27 = vld [vmem:[#allocation10_spill] sm:$0xff] }
  0x3d   : > { %3857 = vmatpush3.msra.mxu1 %v500_v1  ;;  %3868 = vmatpush3.msra.mxu0 %v4842_v59  ;;  %v7735_v1 = vld [vmem:[#allocation11_spill] sm:$0xff] }
  0x3e   : > { %617 = vmatmul.mubr.f32.vlgmr.msra.gmra.mxu1 %v5132_v26  ;;  %3869 = vmatprep.subr.mxu0 %v4857_v0  ;;  %v7740_v26 = vld [vmem:[#allocation16_spill] sm:$0xff] }
  0x3f   : > { %3896 = vmatprep.subr.mxu1 %v4679_v3  ;;  %3870 = vmatpush3.msra.mxu0 %v4871_v8 }
  0x40   : > { %3897 = vmatpush3.msra.mxu1 %v4681_v4  ;;  %3871 = vmatprep.subr.mxu0 %v4885_v42 }
  0x41   : > { %3898 = vmatprep.subr.mxu1 %v4683_v5  ;;  %3872 = vmatpush3.msra.mxu0 %v4903_v20 }
  0x42   : > { %3899 = vmatpush3.msra.mxu1 %v4694_v9  ;;  %3873 = vmatprep.subr.mxu0 %v4920_v21 }
  0x43   : > { %3900 = vmatprep.subr.mxu1 %v4696_v10  ;;  %3874 = vmatpush3.msra.mxu0 %v4932_v6 }
  0x44   : > { %3901 = vmatpush3.msra.mxu1 %v4698_v11  ;;  %3875 = vmatprep.subr.mxu0 %v4965_v55 }
  0x45   : > { %3902 = vmatprep.subr.mxu1 %v4710_v15  ;;  %3876 = vmatpush3.msra.mxu0 %v4981_v28 }
  0x46   : > { %3903 = vmatpush3.msra.mxu1 %v4712_v16  ;;  %3877 = vmatprep.subr.mxu0 %v5005_v34 }
  0x47   : > { %3904 = vmatprep.subr.mxu1 %v4714_v17  ;;  %3878 = vmatpush3.msra.mxu0 %v5022_v46 }
  0x48   : > { %3905 = vmatpush3.msra.mxu1 %v4736_v22  ;;  %3879 = vmatprep.subr.mxu0 %v5034_v60 }
  0x49   : > { %3906 = vmatprep.subr.mxu1 %v7725_v33  ;;  %3880 = vmatpush3.msra.mxu0 %v5048_v14 }
  0x4a   : > { %3907 = vmatpush3.msra.mxu1 %v7726_v61  ;;  %3881 = vmatprep.subr.mxu0 %v7727_v51 }
  0x4b   : > { %3908 = vmatprep.subr.mxu1 %v7728_v52  ;;  %3882 = vmatpush3.msra.mxu0 %v5082_v62 }
  0x4c   : > { %3909 = vmatpush3.msra.mxu1 %v7729_v49  ;;  %3883 = vmatprep.subr.mxu0 %v5105_v32 }
  0x4d   : > { %3910 = vmatprep.subr.mxu1 %v7730_v30  ;;  %3884 = vmatpush3.msra.mxu0 %v5117_v36 }
  0x4e   : > { %3911 = vmatpush3.msra.mxu1 %v7731_v37  ;;  %3885 = vmatprep.subr.mxu0 %v5130_v57 }
  0x4f   : > { %3912 = vmatprep.subr.mxu1 %v7732_v2  ;;  %3886 = vmatpush3.msra.mxu0 %v5143_v50 }
  0x50   : > { %3913 = vmatpush3.msra.mxu1 %v7733_v56  ;;  %3887 = vmatprep.subr.mxu0 %v5155_v13 }
  0x51   : > { %3914 = vmatprep.subr.mxu1 %v7734_v27  ;;  %3888 = vmatpush3.msra.mxu0 %v5162_v19 }
  0x52   : > { %3915 = vmatpush3.msra.mxu1 %v7735_v1  ;;  %3889 = vmatprep.subr.mxu0 %v5179_v54 }
  0x53   : > { %3916 = vmatprep.subr.mxu1 %v7736_v44  ;;  %3890 = vmatpush3.msra.mxu0 %v5189_v43  ;;  %v7741_v43 = vand.u32 4294901760, %v4739_v23  ;;  %v7748_v23 = vand.u32 4294901760, %v4793_v40  ;;  %v7754_v40 = vand.u32 4294901760, %v4871_v8  ;;  %v7760_v8 = vand.u32 4294901760, %v4981_v28 }
  0x54   : > { %3917 = vmatpush3.msra.mxu1 %v7737_v12  ;;  %3891 = vmatprep.subr.mxu0 %v5198_v47  ;;  %v7742_v12 = vld [vmem:[#allocation17_spill] sm:$0xff]  ;;  %v7746_v47 = vld [vmem:[#allocation19_spill] sm:$0xff] }
  0x55   : > { %3918 = vmatprep.subr.mxu1 %v7738_v58  ;;  %3892 = vmatpush3.msra.mxu0 %v5205_v29  ;;  %v7743_v58 = vand.u32 4294901760, %v4745_v25  ;;  %v7744_v29 = vld [vmem:[#allocation18_spill] sm:$0xff]  ;;  %v7749_v25 = vand.u32 4294901760, %v4807_v45  ;;  %v7755_v45 = vand.u32 4294901760, %v4885_v42 }
  0x56   : > { %3919 = vmatpush3.msra.mxu1 %v4977_v63  ;;  %755 = vmatmul.mubr.f32.vlgmr.msra.gmra.mxu0 %v5151_v53  ;;  %v7745_v63 = vand.u32 4294901760, %v4768_v31  ;;  %v7750_v31 = vand.u32 4294901760, %v5139_v38  ;;  %v7766_v38 = vand.u32 4294901760, %v7727_v51 }
  0x57   : > { %3920 = vmatprep.subr.mxu1 %v4994_v39  ;;  %3931 = vmatprep.subr.mxu0 %v7739_v7  ;;  %v7768_v7 = vand.u32 4294901760, %v5082_v62 }
  0x58   : > { %3921 = vmatpush3.msra.mxu1 %v7740_v26  ;;  %3932 = vmatpush3.msra.mxu0 %v7741_v43  ;;  %v7753_v43 = vand.u32 4294901760, %v4857_v0  ;;  %v7757_v0 = vand.u32 4294901760, %v4920_v21  ;;  %v7762_v21 = vand.u32 4294901760, %v5022_v46 }
  0x59   : > { %3922 = vmatprep.subr.mxu1 %v7742_v12  ;;  %3933 = vmatprep.subr.mxu0 %v7743_v58 }
  0x5a   : > { %3923 = vmatpush3.msra.mxu1 %v7744_v29  ;;  %3934 = vmatpush3.msra.mxu0 %v7745_v63  ;;  %v7751_v63 = vand.u32 4294901760, %v4842_v59  ;;  %v7756_v59 = vand.u32 4294901760, %v4903_v20  ;;  %v195_v20 = vld [vmem:[%s7417_s1 + $0x168] sm:$0xff] }
  0x5b   : > { %3924 = vmatprep.subr.mxu1 %v7746_v47  ;;  %3935 = vmatprep.subr.mxu0 %v7747_v18  ;;  %v5366_v46 = vand.u32 4294901760, %v195_v20  ;;  %v7772_v18 = vand.u32 4294901760, %v5130_v57 }
  0x5c   : > { %3925 = vmatpush3.msra.mxu1 %v5078_v41  ;;  %3936 = vmatpush3.msra.mxu0 %v7748_v23  ;;  %v192_v23 = vld [vmem:[%s7417_s1 + $0x150] sm:$0xff] }
  0x5d   : > { %3926 = vmatprep.subr.mxu1 %v5095_v48  ;;  %3937 = vmatprep.subr.mxu0 %v7749_v25  ;;  %7765 = vst [vmem:[#allocation2_spill] sm:$0xff] %v5366_v46  ;;  %v5400_v62 = vsub.f32 %v195_v20, %v5366_v46  ;;  %v7787_v20 = vld [vmem:[#allocation14_spill] sm:$0xff] }
  0x5e   : > { %3927 = vmatpush3.msra.mxu1 %v5113_v24  ;;  %859 = vmatprep.mubr.f32.mxu1 %v7750_v31  ;;  %v7773_v31 = vand.u32 4294901760, %v5143_v50 }
  0x5f   : > { %3938 = vmatpush3.msra.mxu0 %v7751_v63  ;;  %863 = vmatmul.mubr.f32.vlgmr.msra.gmra.mxu1 %v7752_v35  ;;  %v7775_v35 = vand.u32 4294901760, %v5155_v13  ;;  %v191_v13 = vld [vmem:[%s7417_s1 + $0x148] sm:$0xff] }
  0x60   : > { %3939 = vmatprep.subr.mxu0 %v7753_v43  ;;  %3966 = vmatprep.subr.mxu1 %v4679_v3  ;;  %v7758_v3 = vand.u32 4294901760, %v4932_v6  ;;  %v7764_v6 = vand.u32 4294901760, %v5048_v14 }
  0x61   : > { %3940 = vmatpush3.msra.mxu0 %v7754_v40  ;;  %3967 = vmatpush3.msra.mxu1 %v4681_v4  ;;  %v213_v4 = vld [vmem:[%s7417_s1 + $0x1f8] sm:$0xff] }
  0x62   : > { %3941 = vmatprep.subr.mxu0 %v7755_v45  ;;  %3968 = vmatprep.subr.mxu1 %v4683_v5  ;;  %v197_v5 = vld [vmem:[%s7417_s1 + $0x178] sm:$0xff]  ;;  %v5340_v42 = vand.u32 4294901760, %v213_v4 }
  0x63   : > { %3942 = vmatpush3.msra.mxu0 %v7756_v59  ;;  %3969 = vmatpush3.msra.mxu1 %v4694_v9  ;;  %v7759_v9 = vand.u32 4294901760, %v4965_v55  ;;  %v5342_v55 = vand.u32 4294901760, %v197_v5  ;;  %v5445_v59 = vand.u32 4294901760, %v192_v23 }
  0x64   : > { %3943 = vmatprep.subr.mxu0 %v7757_v0  ;;  %3970 = vmatprep.subr.mxu1 %v4696_v10  ;;  %v196_v10 = vld [vmem:[%s7417_s1 + $0x170] sm:$0xff]  ;;  %v5380_v53 = vsub.f32 %v213_v4, %v5340_v42  ;;  %v7780_v0 = vand.u32 4294901760, %v5179_v54  ;;  %v207_v4 = vld [vmem:[%s7417_s1 + $0x1c8] sm:$0xff] }
  0x65   : > { %3944 = vmatpush3.msra.mxu0 %v7758_v3  ;;  %3971 = vmatpush3.msra.mxu1 %v4698_v11  ;;  %v7761_v11 = vand.u32 4294901760, %v5005_v34  ;;  %v7763_v34 = vand.u32 4294901760, %v5034_v60  ;;  %v5375_v60 = vsub.f32 %v197_v5, %v5342_v55  ;;  %7779 = vst [vmem:[#allocation7_spill] sm:$0xff] %v5445_v59  ;;  %v7782_v5 = vld [vmem:[#allocation23_spill] sm:$0xff] }
  0x66   : > { %3945 = vmatprep.subr.mxu0 %v7759_v9  ;;  %3972 = vmatprep.subr.mxu1 %v4710_v15  ;;  %v212_v15 = vld [vmem:[%s7417_s1 + $0x1f0] sm:$0xff]  ;;  %v7784_v9 = vld [vmem:[#allocation13_spill] sm:$0xff] }
  0x67   : > { %3946 = vmatpush3.msra.mxu0 %v7760_v8  ;;  %3973 = vmatpush3.msra.mxu1 %v4712_v16  ;;  %v5353_v16 = vand.u32 4294901760, %v196_v10  ;;  %v5364_v28 = vand.u32 4294901760, %v212_v15 }
  0x68   : > { %3947 = vmatprep.subr.mxu0 %v7761_v11  ;;  %3974 = vmatprep.subr.mxu1 %v4714_v17  ;;  %v211_v17 = vld [vmem:[%s7417_s1 + $0x1e8] sm:$0xff]  ;;  %v7785_v11 = vld [vmem:[#allocation24_spill] sm:$0xff] }
  0x69   : > { %3948 = vmatpush3.msra.mxu0 %v7762_v21  ;;  %3975 = vmatpush3.msra.mxu1 %v4736_v22  ;;  %v194_v22 = vld [vmem:[%s7417_s1 + $0x160] sm:$0xff]  ;;  %v5377_v14 = vand.u32 4294901760, %v211_v17  ;;  %v5386_v58 = vsub.f32 %v196_v10, %v5353_v16 }
  0x6a   : > { %3949 = vmatprep.subr.mxu0 %v7763_v34  ;;  %3976 = vmatprep.subr.mxu1 %v7725_v33  ;;  %v7769_v33 = vand.u32 4294901760, %v5105_v32  ;;  %v5394_v51 = vand.u32 4294901760, %v194_v22  ;;  %v209_v32 = vld [vmem:[%s7417_s1 + $0x1d8] sm:$0xff]  ;;  %v206_v34 = vld [vmem:[%s7417_s1 + $0x1c0] sm:$0xff] }
  0x6b   : > { %3950 = vmatpush3.msra.mxu0 %v7764_v6  ;;  %3977 = vmatpush3.msra.mxu1 %v7726_v61  ;;  %7767 = vst [vmem:[#allocation3_spill] sm:$0xff] %v5377_v14  ;;  %v210_v61 = vld [vmem:[%s7417_s1 + $0x1e0] sm:$0xff]  ;;  %v5420_v25 = vsub.f32 %v211_v17, %v5377_v14  ;;  %v7491_v63 = vand.u32 4294901760, %v5386_v58  ;;  %v5437_v50 = vand.u32 4294901760, %v209_v32  ;;  %v5487_v17 = vand.u32 4294901760, %v191_v13 }
  0x6c   : > { %3951 = vmatprep.subr.mxu0 %v7766_v38  ;;  %3978 = vmatprep.subr.mxu1 %v7728_v52  ;;  %7770 = vst [vmem:[#allocation20_spill] sm:$0xff] %v5394_v51  ;;  %v7771_v52 = vand.u32 4294901760, %v5117_v36  ;;  %v7494_v36 = vand.u32 4294901760, %v5380_v53  ;;  %v5425_v57 = vand.u32 4294901760, %v210_v61  ;;  %v5435_v43 = vsub.f32 %v194_v22, %v5394_v51  ;;  %v190_v6 = vld [vmem:[%s7417_s1 + $0x140] sm:$0xff] }
  0x6d   : > { %3952 = vmatpush3.msra.mxu0 %v7768_v7  ;;  %3979 = vmatpush3.msra.mxu1 %v7729_v49  ;;  %v193_v49 = vld [vmem:[%s7417_s1 + $0x158] sm:$0xff]  ;;  %7776 = vst [vmem:[#allocation5_spill] sm:$0xff] %v5437_v50  ;;  %v7490_v54 = vand.u32 4294901760, %v5420_v25  ;;  %v5476_v10 = vsub.f32 %v5386_v58, %v7491_v63  ;;  %7788 = vst [vmem:[#allocation9_spill] sm:$0xff] %v5487_v17  ;;  %v5497_v38 = vsub.f32 %v209_v32, %v5437_v50 }
  0x6e   : > { %3953 = vmatprep.subr.mxu0 %v7769_v33  ;;  %3980 = vmatprep.subr.mxu1 %v7730_v30  ;;  %v5409_v30 = vsub.f32 %v212_v15, %v5364_v28  ;;  %7774 = vst [vmem:[#allocation4_spill] sm:$0xff] %v5425_v57  ;;  %v5439_v40 = vand.u32 4294901760, %v193_v49  ;;  %v5479_v8 = vsub.f32 %v210_v61, %v5425_v57  ;;  %v7786_v15 = vand.u32 4294901760, %v7785_v11  ;;  %v7789_v7 = vld [vmem:[#allocation25_spill] sm:$0xff] }
  0x6f   : > { %3954 = vmatpush3.msra.mxu0 %v7771_v52  ;;  %3981 = vmatpush3.msra.mxu1 %v7731_v37  ;;  %v7493_v37 = vand.u32 4294901760, %v5375_v60  ;;  %v7489_v22 = vand.u32 4294901760, %v5435_v43  ;;  %v7790_v33 = vand.u32 4294901760, %v7789_v7  ;;  %v7791_v61 = vld [vmem:[#allocation21_spill] sm:$0xff] }
  0x70   : > { %3955 = vmatprep.subr.mxu0 %v7772_v18  ;;  %3982 = vmatprep.subr.mxu1 %v7732_v2  ;;  %v208_v2 = vld [vmem:[%s7417_s1 + $0x1d0] sm:$0xff]  ;;  %7777 = vst [vmem:[#allocation6_spill] sm:$0xff] %v5439_v40  ;;  %v7492_v45 = vand.u32 4294901760, %v5409_v30  ;;  %v5485_v21 = vsub.f32 %v193_v49, %v5439_v40  ;;  %v5508_v49 = vsub.f32 %v192_v23, %v5445_v59  ;;  %v5510_v18 = vand.u32 4294901760, %v207_v4 }
  0x71   : > { %3956 = vmatpush3.msra.mxu0 %v7773_v31  ;;  %3983 = vmatpush3.msra.mxu1 %v7733_v56  ;;  %v7778_v56 = vand.u32 4294901760, %v5162_v19  ;;  %v5457_v19 = vsub.f32 %v5380_v53, %v7494_v36  ;;  %v5464_v3 = vand.u32 4294901760, %v208_v2  ;;  %v7793_v31 = vld [vmem:[#allocation15_spill] sm:$0xff]  ;;  %v5524_v23 = vsub.f32 %v5420_v25, %v7490_v54 }
  0x72   : > { %3957 = vmatprep.subr.mxu0 %v7775_v35  ;;  %3984 = vmatprep.subr.mxu1 %v7734_v27  ;;  %v7488_v27 = vand.u32 4294901760, %v5400_v62  ;;  %v5505_v52 = vsub.f32 %v5409_v30, %v7492_v45  ;;  %7792 = vst [vmem:[#allocation10_spill] sm:$0xff] %v5510_v18  ;;  %v7794_v35 = vld [vmem:[#allocation22_spill] sm:$0xff]  ;;  %v7495_v11 = vand.u32 4294901760, %v5479_v8  ;;  %v5551_v7 = vsub.f32 %v5435_v43, %v7489_v22  ;;  %v5565_v22 = vld [vmem:[%s7417_s1 + $0x1b0] sm:$0xff]  ;;  %v187_v36 = vld [vmem:[%s7417_s1 + $0x128] sm:$0xff] }
  0x73   : > { %3958 = vmatpush3.msra.mxu0 %v7778_v56  ;;  %3985 = vmatpush3.msra.mxu1 %v7735_v1  ;;  %v5462_v1 = vsub.f32 %v5375_v60, %v7493_v37  ;;  %7781 = vst [vmem:[#allocation8_spill] sm:$0xff] %v5464_v3  ;;  %v7498_v54 = vand.u32 4294901760, %v5508_v49  ;;  %v5569_v63 = vsub.f32 %v207_v4, %v5510_v18 }
  0x74   : > { %3959 = vmatprep.subr.mxu0 %v7780_v0  ;;  %3986 = vmatprep.subr.mxu1 %v7736_v44  ;;  %v7783_v44 = vand.u32 4294901760, %v7782_v5  ;;  %v5515_v32 = vsub.f32 %v5400_v62, %v7488_v27  ;;  %v5527_v5 = vsub.f32 %v208_v2, %v5464_v3  ;;  %v189_v2 = vld [vmem:[%s7417_s1 + $0x138] sm:$0xff]  ;;  %v188_v27 = vld [vmem:[%s7417_s1 + $0x130] sm:$0xff] }
  0x75   : > { %3987 = vmatpush3.msra.mxu1 %v7784_v9  ;;  %1029 = vmatprep.mubr.f32.mxu0 %v7791_v61  ;;  %v5532_v9 = vand.u32 4294901760, %v206_v34 }
  0x76   : > { %3960 = vmatpush3.msra.mxu0 %v7783_v44  ;;  %3988 = vmatprep.subr.mxu1 %v7787_v20  ;;  %v205_v20 = vld [vmem:[%s7417_s1 + $0x1b8] sm:$0xff]  ;;  %v7499_v37 = vand.u32 4294901760, %v5527_v5  ;;  %v186_v44 = vld [vmem:[%s7417_s1 + $0x120] sm:$0xff] }
  0x77   : > { %3961 = vmatprep.subr.mxu0 %v7786_v15  ;;  %3989 = vmatpush3.msra.mxu1 %v7793_v31  ;;  %7795 = vst [vmem:[#allocation11_spill] sm:$0xff] %v5532_v9  ;;  %v5535_v15 = vand.u32 4294901760, %v190_v6  ;;  %v7497_v31 = vand.u32 4294901760, %v5485_v21  ;;  %v5574_v45 = vand.u32 4294901760, %v205_v20 }
  0x78   : > { %3962 = vmatpush3.msra.mxu0 %v7790_v33  ;;  %3990 = vmatprep.subr.mxu1 %v4994_v39  ;;  %v5546_v39 = vsub.f32 %v191_v13, %v5487_v17  ;;  %v7496_v33 = vand.u32 4294901760, %v5497_v38  ;;  %v5592_v13 = vand.u32 4294901760, %v188_v27  ;;  %v5641_v56 = vsub.f32 %v5527_v5, %v7499_v37 }
  0x79   : > { %1031 = vmatmul.mubr.f32.vlgmr.msra.gmra.mxu0 %v7794_v35  ;;  %4001 = vmatprep.subr.mxu0 %v5340_v42  ;;  %7796 = vst [vmem:[#allocation12_spill] sm:$0xff] %v5535_v15  ;;  %7798 = vst [vmem:[#allocation17_spill] sm:$0xff] %v5574_v45  ;;  %v5590_v4 = vsub.f32 %v190_v6, %v5535_v15  ;;  %v5646_v0 = vsub.f32 %v205_v20, %v5574_v45  ;;  %v7809_v37 = vand.u32 4294901760, %v5462_v1  ;;  %v184_v1 = vld [vmem:[%s7417_s1 + $0x110] sm:$0xff] }
  0x7a   : > { %3991 = vmatpush3.msra.mxu1 %v7740_v26  ;;  %4002 = vmatpush3.msra.mxu0 %v5342_v55  ;;  %7797 = vst [vmem:[#allocation16_spill] sm:$0xff] %v5546_v39  ;;  %v1376_v26 = vand.u32 4294901760, %v5505_v52  ;;  %v5576_v52 = vand.u32 4294901760, %v189_v2  ;;  %7801 = vst [vmem:[#allocation23_spill] sm:$0xff] %v5592_v13  ;;  %v5606_v6 = vsub.f32 %v5497_v38, %v7496_v33  ;;  %v203_v33 = vld [vmem:[%s7417_s1 + $0x1a8] sm:$0xff] }
  0x7b   : > { %3992 = vmatprep.subr.mxu1 %v7742_v12  ;;  %4003 = vmatprep.subr.mxu0 %v5364_v28  ;;  %7800 = vst [vmem:[#allocation19_spill] sm:$0xff] %v5590_v4  ;;  %v5595_v12 = vsub.f32 %v206_v34, %v5532_v9  ;;  %v5611_v34 = vsub.f32 %v5485_v21, %v7497_v31  ;;  %v5627_v31 = vand.u32 4294901760, %v187_v36 }
  0x7c   : > { %3993 = vmatpush3.msra.mxu1 %v7744_v29  ;;  %4004 = vmatpush3.msra.mxu0 %v5353_v16  ;;  %7799 = vst [vmem:[#allocation18_spill] sm:$0xff] %v5576_v52  ;;  %v5587_v29 = vsub.f32 %v5479_v8, %v7495_v11  ;;  %v5614_v11 = vand.u32 4294901760, %v5565_v22  ;;  %v1397_v20 = vand.u32 4294901760, %v5606_v6 }
  0x7d   : > { %3994 = vmatprep.subr.mxu1 %v7746_v47  ;;  %4005 = vmatprep.subr.mxu0 %v5377_v14  ;;  %7802 = vst [vmem:[#allocation13_spill] sm:$0xff] %v5595_v12  ;;  %7804 = vst [vmem:[#allocation14_spill] sm:$0xff] %v5627_v31  ;;  %v5643_v47 = vand.u32 4294901760, %v186_v44 }
  0x7e   : > { %3995 = vmatpush3.msra.mxu1 %v5078_v41  ;;  %4006 = vmatpush3.msra.mxu0 %v5366_v46  ;;  %7803 = vst [vmem:[#allocation24_spill] sm:$0xff] %v5614_v11  ;;  %v5621_v41 = vsub.f32 %v5508_v49, %v7498_v54  ;;  %v5636_v54 = vsub.f32 %v189_v2, %v5576_v52  ;;  %v145_v2 = vld [vmem:[%s5061_s25 + $0x18] sm:$0xff] }
  0x7f   : > { %3996 = vmatprep.subr.mxu1 %v5095_v48  ;;  %4007 = vmatprep.subr.mxu0 %v5425_v57  ;;  %v202_v48 = vld [vmem:[%s7417_s1 + $0x1a0] sm:$0xff]  ;;  %7805 = vst [vmem:[#allocation25_spill] sm:$0xff] %v5643_v47  ;;  %v7807_v57 = vand.u32 4294901760, %v5457_v19  ;;  %v7810_v19 = vand.u32 4294901760, %v5569_v63 }
  0x80   : > { %3997 = vmatpush3.msra.mxu1 %v5113_v24  ;;  %1133 = vmatprep.mubr.f32.mxu1 %v7791_v61  ;;  %v1390_v24 = vand.u32 4294901760, %v5587_v29  ;;  %v5652_v61 = vsub.f32 %v188_v27, %v5592_v13  ;;  %v5663_v29 = vand.u32 4294901760, %v202_v48  ;;  %v185_v27 = vld [vmem:[%s7417_s1 + $0x118] sm:$0xff] }
  0x81   : > { %4008 = vmatpush3.msra.mxu0 %v5394_v51  ;;  %1135 = vmatmul.mubr.f32.vlgmr.msra.gmra.mxu1 %v7794_v35  ;;  %v1285_v51 = vand.u32 4294901760, %v5611_v34  ;;  %v5661_v35 = vand.u32 4294901760, %v203_v33  ;;  %v5676_v6 = vsub.f32 %v5569_v63, %v7810_v19  ;;  %v5679_v34 = vsub.f32 %v187_v36, %v5627_v31  ;;  %v201_v36 = vld [vmem:[%s7417_s1 + $0x198] sm:$0xff] }
  0x82   : > { %7806 = vst [vmem:[#allocation21_spill] sm:$0xff] %v5652_v61  ;;  %4009 = vmatprep.subr.mxu0 %v5437_v50  ;;  %4036 = vmatprep.subr.mxu1 %v7807_v57  ;;  %v7811_v50 = vand.u32 4294901760, %v5546_v39  ;;  %v1404_v57 = vand.u32 4294901760, %v5641_v56  ;;  %v5693_v19 = vsub.f32 %v186_v44, %v5643_v47  ;;  %v7814_v56 = vand.u32 4294901760, %v5595_v12 }
  0x83   : > { %7808 = vst [vmem:[#allocation15_spill] sm:$0xff] %v5661_v35  ;;  %4010 = vmatpush3.msra.mxu0 %v5439_v40  ;;  %4037 = vmatpush3.msra.mxu1 %v7809_v37  ;;  %v144_v37 = vld [vmem:[%s5061_s25 + $0x10] sm:$0xff]  ;;  %v5701_v40 = vsub.f32 %v5565_v22, %v5614_v11  ;;  %v1411_v14 = vand.u32 4294901760, %v5676_v6 }
  0x84   : > { %v5684_v46 = vsub.f32 %v5546_v39, %v7811_v50  ;;  %4011 = vmatprep.subr.mxu0 %v5464_v3  ;;  %4038 = vmatprep.subr.mxu1 %v1376_v26  ;;  %7812 = vst [vmem:[#allocation22_spill] sm:$0xff] %v5693_v19  ;;  %v7813_v3 = vand.u32 4294901760, %v5476_v10  ;;  %v5709_v44 = vsub.f32 %v5595_v12, %v7814_v56  ;;  %v7815_v26 = vand.u32 4294901760, %v5590_v4  ;;  %v200_v22 = vld [vmem:[%s7417_s1 + $0x190] sm:$0xff] }
  0x85   : > { %4012 = vmatpush3.msra.mxu0 %v5445_v59  ;;  %v5716_v50 = vand.u32 4294901760, %v185_v27  ;;  %v5721_v59 = vand.u32 4294901760, %v145_v2  ;;  %v5727_v56 = vand.u32 4294901760, %v184_v1  ;;  %v7819_v12 = vand.u32 4294901760, %v5515_v32  ;;  %v183_v32 = vld [vmem:[%s7417_s1 + $0x108] sm:$0xff] }
  0x86   : > { %4039 = vmatpush3.msra.mxu1 %v7813_v3  ;;  %v5714_v39 = vsub.f32 %v5590_v4, %v7815_v26  ;;  %4013 = vmatprep.subr.mxu0 %v5510_v18  ;;  %v7817_v3 = vand.u32 4294901760, %v5524_v23  ;;  %v5730_v26 = vsub.f32 %v203_v33, %v5661_v35  ;;  %v5732_v4 = vand.u32 4294901760, %v144_v37 }
  0x87   : > { %7816 = vst [vmem:[#allocation26_spill] sm:$0xff] %v5721_v59  ;;  %4014 = vmatpush3.msra.mxu0 %v5487_v17  ;;  %v1299_v18 = vand.u32 4294901760, %v5684_v46  ;;  %v5739_v23 = vand.u32 4294901760, %v201_v36  ;;  %v7820_v33 = vand.u32 4294901760, %v5646_v0  ;;  %v5748_v17 = vand.u32 4294901760, %v200_v22  ;;  %v199_v46 = vld [vmem:[%s7417_s1 + $0x188] sm:$0xff]  ;;  %1477 = vmatprep.mubr.f32.mxu1 %v5721_v59 }
  0x88   : > { %4040 = vmatprep.subr.mxu1 %v7817_v3  ;;  %7818 = vst [vmem:[#allocation27_spill] sm:$0xff] %v5732_v4  ;;  %4015 = vmatprep.subr.mxu0 %v5532_v9  ;;  %v1418_v6 = vand.u32 4294901760, %v5709_v44  ;;  %v5763_v3 = vsub.f32 %v185_v27, %v5716_v50  ;;  %v5769_v9 = vsub.f32 %v145_v2, %v5721_v59  ;;  %v198_v27 = vld [vmem:[%s7417_s1 + $0x180] sm:$0xff]  ;;  %v7859_v59 = vld [vmem:[#allocation23_spill] sm:$0xff] }
  0x89   : > { %4041 = vmatpush3.msra.mxu1 %v7819_v12  ;;  %v5746_v10 = vsub.f32 %v5646_v0, %v7820_v33  ;;  %7821 = vst [vmem:[#allocation28_spill] sm:$0xff] %v5748_v17  ;;  %v5755_v12 = vsub.f32 %v202_v48, %v5663_v29  ;;  %4016 = vmatpush3.msra.mxu0 %v5535_v15  ;;  %v1306_v33 = vand.u32 4294901760, %v5714_v39  ;;  %v182_v2 = vld [vmem:[%s7417_s1 + $0x100] sm:$0xff]  ;;  %v7825_v15 = vand.u32 4294901760, %v5701_v40 }
  0x8a   : > { %4042 = vmatprep.subr.mxu1 %v1390_v24  ;;  %v7822_v24 = vand.u32 4294901760, %v5551_v7  ;;  %4017 = vmatprep.subr.mxu0 %v5574_v45  ;;  %v7823_v7 = vand.u32 4294901760, %v5636_v54  ;;  %v5776_v44 = vsub.f32 %v184_v1, %v5727_v56  ;;  %v5796_v45 = vsub.f32 %v201_v36, %v5739_v23 }
  0x8b   : > { %4018 = vmatpush3.msra.mxu0 %v5576_v52  ;;  %v5803_v52 = vand.u32 4294901760, %v183_v32  ;;  %v7826_v39 = vand.u32 4294901760, %v5621_v41  ;;  %v5809_v36 = vand.u32 4294901760, %v198_v27  ;;  %v7542_v41 = vand.u32 4294901760, %v5693_v19 }
  0x8c   : > { %4043 = vmatpush3.msra.mxu1 %v7822_v24  ;;  %v1312_v48 = vsub.f32 %v5636_v54, %v7823_v7  ;;  %v5786_v24 = vsub.f32 %v144_v37, %v5732_v4  ;;  %v5792_v7 = vand.u32 4294901760, %v199_v46  ;;  %4019 = vmatprep.subr.mxu0 %v5614_v11  ;;  %v1425_v37 = vand.u32 4294901760, %v5746_v10 }
  0x8d   : > { %4044 = vmatprep.subr.mxu1 %v1397_v20  ;;  %v7824_v20 = vand.u32 4294901760, %v5652_v61  ;;  %4020 = vmatpush3.msra.mxu0 %v5592_v13  ;;  %v5815_v10 = vsub.f32 %v200_v22, %v5748_v17 }
  0x8e   : > { %4045 = vmatpush3.msra.mxu1 %v1285_v51  ;;  %v1431_v51 = vsub.f32 %v5701_v40, %v7825_v15  ;;  %4021 = vmatprep.subr.mxu0 %v5661_v35  ;;  %v1313_v15 = vand.u32 4294901760, %v1312_v48 }
  0x8f   : > { %v1319_v1 = vsub.f32 %v5652_v61, %v7824_v20  ;;  %4046 = vmatprep.subr.mxu1 %v1404_v57  ;;  %v5811_v61 = vand.u32 4294901760, %v182_v2  ;;  %v7827_v20 = vand.u32 4294901760, %v5730_v26  ;;  %4022 = vmatpush3.msra.mxu0 %v5627_v31  ;;  %v7828_v57 = vand.u32 4294901760, %v5679_v34 }
  0x90   : > { %4047 = vmatpush3.msra.mxu1 %v7826_v39  ;;  %4023 = vmatprep.subr.mxu0 %v5663_v29  ;;  %v1432_v48 = vand.u32 4294901760, %v1431_v51  ;;  %v7829_v39 = vand.u32 4294901760, %v5755_v12 }
  0x91   : > { %4048 = vmatprep.subr.mxu1 %v1411_v14  ;;  %v1438_v13 = vsub.f32 %v5730_v26, %v7827_v20  ;;  %v1320_v11 = vand.u32 4294901760, %v1319_v1  ;;  %v1326_v22 = vsub.f32 %v5679_v34, %v7828_v57  ;;  %v5829_v14 = vsub.f32 %v199_v46, %v5792_v7  ;;  %4024 = vmatpush3.msra.mxu0 %v5643_v47 }
  0x92   : > { %4049 = vmatpush3.msra.mxu1 %v1299_v18  ;;  %v5833_v20 = vsub.f32 %v183_v32, %v5803_v52  ;;  %v1445_v18 = vsub.f32 %v5755_v12, %v7829_v39  ;;  %v5841_v57 = vsub.f32 %v182_v2, %v5811_v61  ;;  %v7831_v46 = vand.u32 4294901760, %v5769_v9  ;;  %4025 = vmatprep.subr.mxu0 %v5739_v23 }
  0x93   : > { %4050 = vmatprep.subr.mxu1 %v1418_v6  ;;  %v5848_v32 = vsub.f32 %v198_v27, %v5809_v36  ;;  %v1439_v39 = vand.u32 4294901760, %v1438_v13  ;;  %v7833_v2 = vand.u32 4294901760, %v5786_v24  ;;  %4026 = vmatpush3.msra.mxu0 %v5716_v50  ;;  %v7834_v27 = vand.u32 4294901760, %v5796_v45 }
  0x94   : > { %4051 = vmatpush3.msra.mxu1 %v1306_v33  ;;  %7830 = vst [vmem:[#allocation29_spill] sm:$0xff] %v5841_v57  ;;  %v1239_v6 = vsub.f32 %v5769_v9, %v7831_v46  ;;  %v1333_v33 = vsub.f32 %v5693_v19, %v7542_v41  ;;  %v1327_v46 = vand.u32 4294901760, %v1326_v22  ;;  %4027 = vmatprep.subr.mxu0 %v5748_v17  ;;  %v7835_v41 = vand.u32 4294901760, %v5763_v3 }
  0x95   : > { %7832 = vst [vmem:[#allocation30_spill] sm:$0xff] %v5848_v32  ;;  %4052 = vmatprep.subr.mxu1 %v1425_v37  ;;  %v1245_v1 = vsub.f32 %v5786_v24, %v7833_v2  ;;  %v1452_v51 = vsub.f32 %v5796_v45, %v7834_v27  ;;  %v1446_v37 = vand.u32 4294901760, %v1445_v18  ;;  %4028 = vmatpush3.msra.mxu0 %v5727_v56  ;;  %v7836_v22 = vand.u32 4294901760, %v5815_v10 }
  0x96   : > { %4053 = vmatpush3.msra.mxu1 %v1313_v15  ;;  %v1340_v2 = vsub.f32 %v5763_v3, %v7835_v41  ;;  %v1240_v15 = vand.u32 4294901760, %v1239_v6  ;;  %v7546_v13 = vand.u32 4294901760, %v5848_v32  ;;  %4029 = vmatprep.subr.mxu0 %v5792_v7  ;;  %v7837_v17 = vand.u32 4294901760, %v5776_v44 }
  0x97   : > { %4054 = vmatprep.subr.mxu1 %v1432_v48  ;;  %v1459_v27 = vsub.f32 %v5815_v10, %v7836_v22  ;;  %v1334_v48 = vand.u32 4294901760, %v1333_v33  ;;  %v1246_v18 = vand.u32 4294901760, %v1245_v1  ;;  %v7545_v35 = vand.u32 4294901760, %v5841_v57  ;;  %4030 = vmatpush3.msra.mxu0 %v5803_v52 }
  0x98   : > { %4055 = vmatpush3.msra.mxu1 %v1320_v11  ;;  %v1347_v41 = vsub.f32 %v5776_v44, %v7837_v17  ;;  %v1453_v11 = vand.u32 4294901760, %v1452_v51  ;;  %v7838_v6 = vand.u32 4294901760, %v5829_v14  ;;  %4031 = vmatprep.subr.mxu0 %v5809_v36  ;;  %v7839_v1 = vand.u32 4294901760, %v5833_v20 }
  0x99   : > { %4056 = vmatprep.subr.mxu1 %v1439_v39  ;;  %v1341_v39 = vand.u32 4294901760, %v1340_v2  ;;  %4032 = vmatpush3.msra.mxu0 %v5811_v61  ;;  %v1460_v17 = vand.u32 4294901760, %v1459_v27  ;;  %v1473_v51 = vsub.f32 %v5848_v32, %v7546_v13  ;;  %v7857_v13 = vld [vmem:[#allocation18_spill] sm:$0xff] }
  0x9a   : > { %4057 = vmatpush3.msra.mxu1 %v1327_v46  ;;  %v1466_v22 = vsub.f32 %v5829_v14, %v7838_v6  ;;  %v1354_v33 = vsub.f32 %v5833_v20, %v7839_v1  ;;  %1241 = vmatprep.mubr.f32.mxu0 %v1240_v15  ;;  %v1348_v46 = vand.u32 4294901760, %v1347_v41  ;;  %v7841_v41 = vld [vmem:[#allocation16_spill] sm:$0xff]  ;;  %v7843_v6 = vld [vmem:[#allocation13_spill] sm:$0xff] }
  0x9b   : > { %4058 = vmatprep.subr.mxu1 %v1446_v37  ;;  %1247 = vmatmul.mubr.f32.vlgmr.msra.gmra.mxu0 %v1246_v18  ;;  %v1361_v37 = vsub.f32 %v5841_v57, %v7545_v35  ;;  %v1474_v27 = vand.u32 4294901760, %v1473_v51  ;;  %v7840_v18 = vld [vmem:[#allocation3_spill] sm:$0xff]  ;;  %v7846_v1 = vld [vmem:[#allocation20_spill] sm:$0xff]  ;;  %v7856_v35 = vld [vmem:[#allocation17_spill] sm:$0xff] }
  0x9c   : > { %4059 = vmatpush3.msra.mxu1 %v1334_v48  ;;  %4071 = vmatprep.subr.mxu0 %v5380_v53  ;;  %v1467_v2 = vand.u32 4294901760, %v1466_v22  ;;  %v1355_v15 = vand.u32 4294901760, %v1354_v33  ;;  %v7844_v22 = vld [vmem:[#allocation4_spill] sm:$0xff]  ;;  %v7847_v33 = vld [vmem:[#allocation5_spill] sm:$0xff] }
  0x9d   : > { %4060 = vmatprep.subr.mxu1 %v1453_v11  ;;  %4072 = vmatpush3.msra.mxu0 %v5375_v60  ;;  %v1362_v48 = vand.u32 4294901760, %v1361_v37  ;;  %v7842_v11 = vld [vmem:[#allocation2_spill] sm:$0xff]  ;;  %v7849_v51 = vld [vmem:[#allocation8_spill] sm:$0xff]  ;;  %v7851_v37 = vld [vmem:[#allocation7_spill] sm:$0xff] }
  0x9e   : > { %4061 = vmatpush3.msra.mxu1 %v1341_v39  ;;  %4073 = vmatprep.subr.mxu0 %v5409_v30  ;;  %v7845_v39 = vld [vmem:[#allocation19_spill] sm:$0xff] }
  0x9f   : > { %4062 = vmatprep.subr.mxu1 %v1460_v17  ;;  %4074 = vmatpush3.msra.mxu0 %v5386_v58  ;;  %v7848_v17 = vld [vmem:[#allocation6_spill] sm:$0xff] }
  0xa0   : > { %4063 = vmatpush3.msra.mxu1 %v1348_v46  ;;  %4075 = vmatprep.subr.mxu0 %v5420_v25  ;;  %v7850_v46 = vld [vmem:[#allocation21_spill] sm:$0xff] }
  0xa1   : > { %4064 = vmatprep.subr.mxu1 %v1467_v2  ;;  %4076 = vmatpush3.msra.mxu0 %v5400_v62  ;;  %v7852_v2 = vld [vmem:[#allocation10_spill] sm:$0xff] }
  0xa2   : > { %4065 = vmatpush3.msra.mxu1 %v1355_v15  ;;  %4077 = vmatprep.subr.mxu0 %v5479_v8  ;;  %v7853_v15 = vld [vmem:[#allocation9_spill] sm:$0xff] }
  0xa3   : > { %4066 = vmatprep.subr.mxu1 %v1474_v27  ;;  %4078 = vmatpush3.msra.mxu0 %v5435_v43  ;;  %v7854_v27 = vld [vmem:[#allocation11_spill] sm:$0xff] }
  0xa4   : > { %4067 = vmatpush3.msra.mxu1 %v1362_v48  ;;  %4079 = vmatprep.subr.mxu0 %v5497_v38  ;;  %v7855_v48 = vld [vmem:[#allocation12_spill] sm:$0xff] }
  0xa5   : > { %1479 = vmatmul.mubr.f32.vlgmr.msra.gmra.mxu1 %v5732_v4  ;;  %4106 = vmatprep.subr.mxu1 %v5340_v42  ;;  %v7858_v4 = vld [vmem:[#allocation24_spill] sm:$0xff] }
  0xa6   : > { %4080 = vmatpush3.msra.mxu0 %v5485_v21  ;;  %4107 = vmatpush3.msra.mxu1 %v5342_v55 }
  0xa7   : > { %4081 = vmatprep.subr.mxu0 %v5527_v5  ;;  %4108 = vmatprep.subr.mxu1 %v5364_v28 }
  0xa8   : > { %4082 = vmatpush3.msra.mxu0 %v5508_v49  ;;  %4109 = vmatpush3.msra.mxu1 %v5353_v16 }
  0xa9   : > { %4083 = vmatprep.subr.mxu0 %v5569_v63  ;;  %4110 = vmatprep.subr.mxu1 %v7840_v18 }
  0xaa   : > { %4084 = vmatpush3.msra.mxu0 %v7841_v41  ;;  %4111 = vmatpush3.msra.mxu1 %v7842_v11 }
  0xab   : > { %4085 = vmatprep.subr.mxu0 %v7843_v6  ;;  %4112 = vmatprep.subr.mxu1 %v7844_v22 }
  0xac   : > { %4086 = vmatpush3.msra.mxu0 %v7845_v39  ;;  %4113 = vmatpush3.msra.mxu1 %v7846_v1 }
  0xad   : > { %4087 = vmatprep.subr.mxu0 %v5646_v0  ;;  %4114 = vmatprep.subr.mxu1 %v7847_v33 }
  0xae   : > { %4088 = vmatpush3.msra.mxu0 %v5636_v54  ;;  %4115 = vmatpush3.msra.mxu1 %v7848_v17 }
  0xaf   : > { %4089 = vmatprep.subr.mxu0 %v5701_v40  ;;  %4116 = vmatprep.subr.mxu1 %v7849_v51 }
  0xb0   : > { %4090 = vmatpush3.msra.mxu0 %v7850_v46  ;;  %4117 = vmatpush3.msra.mxu1 %v7851_v37 }
  0xb1   : > { %4091 = vmatprep.subr.mxu0 %v5730_v26  ;;  %4118 = vmatprep.subr.mxu1 %v7852_v2 }
  0xb2   : > { %4092 = vmatpush3.msra.mxu0 %v5679_v34  ;;  %4119 = vmatpush3.msra.mxu1 %v7853_v15 }
  0xb3   : > { %4093 = vmatprep.subr.mxu0 %v5755_v12  ;;  %4120 = vmatprep.subr.mxu1 %v7854_v27 }
  0xb4   : > { %4094 = vmatpush3.msra.mxu0 %v5693_v19  ;;  %4121 = vmatpush3.msra.mxu1 %v7855_v48  ;;  %v7860_v19 = vld [vmem:[#allocation15_spill] sm:$0xff] }
  0xb5   : > { %4095 = vmatprep.subr.mxu0 %v5796_v45  ;;  %4122 = vmatprep.subr.mxu1 %v7856_v35 }
  0xb6   : > { %4096 = vmatpush3.msra.mxu0 %v5763_v3  ;;  %4123 = vmatpush3.msra.mxu1 %v7857_v13 }
  0xb7   : > { %4097 = vmatprep.subr.mxu0 %v5815_v10  ;;  %4124 = vmatprep.subr.mxu1 %v7858_v4 }
  0xb8   : > { %4098 = vmatpush3.msra.mxu0 %v5776_v44  ;;  %4125 = vmatpush3.msra.mxu1 %v7859_v59 }
  0xb9   : > { %4099 = vmatprep.subr.mxu0 %v5829_v14  ;;  %4126 = vmatprep.subr.mxu1 %v7860_v19  ;;  %v7861_v19 = vand.u32 4294901760, %v5380_v53  ;;  %v7866_v53 = vand.u32 4294901760, %v5420_v25  ;;  %v7871_v25 = vand.u32 4294901760, %v5786_v24 }
  0xba   : > { %4100 = vmatpush3.msra.mxu0 %v5833_v20  ;;  %4127 = vmatpush3.msra.mxu1 %v5627_v31  ;;  %v7862_v31 = vand.u32 4294901760, %v5375_v60  ;;  %v7867_v60 = vand.u32 4294901760, %v5400_v62  ;;  %v7873_v62 = vand.u32 4294901760, %v5485_v21 }
  0xbb   : > { %4101 = vmatprep.subr.mxu0 %v5848_v32  ;;  %4128 = vmatprep.subr.mxu1 %v5663_v29  ;;  %v7863_v32 = vld [vmem:[#allocation28_spill] sm:$0xff] }
  0xbc   : > { %4102 = vmatpush3.msra.mxu0 %v5841_v57  ;;  %1614 = vmatprep.mubr.f32.mxu0 %v5769_v9  ;;  %v7864_v57 = vand.u32 4294901760, %v5409_v30  ;;  %v7868_v30 = vand.u32 4294901760, %v5479_v8  ;;  %v7874_v8 = vand.u32 4294901760, %v5527_v5  ;;  %v7880_v5 = vand.u32 4294901760, %v5646_v0 }
  0xbd   : > { %4129 = vmatpush3.msra.mxu1 %v5643_v47  ;;  %1617 = vmatmul.mubr.f32.vlgmr.msra.gmra.mxu0 %v5786_v24  ;;  %v7865_v47 = vand.u32 4294901760, %v5386_v58  ;;  %v7869_v58 = vand.u32 4294901760, %v5769_v9  ;;  %v244_v9 = vld [vmem:[%s7417_s1 + $0x2f0] sm:$0xff]  ;;  %v7882_v0 = vand.u32 4294901760, %v5701_v40  ;;  %v226_v40 = vld [vmem:[%s7417_s1 + $0x260] sm:$0xff] }
  0xbe   : > { %4130 = vmatprep.subr.mxu1 %v5739_v23  ;;  %4141 = vmatprep.subr.mxu0 %v7861_v19  ;;  %v7881_v19 = vand.u32 4294901760, %v5636_v54  ;;  %v227_v54 = vld [vmem:[%s7417_s1 + $0x268] sm:$0xff] }
  0xbf   : > { %4131 = vmatpush3.msra.mxu1 %v5716_v50  ;;  %4142 = vmatpush3.msra.mxu0 %v7862_v31  ;;  %v7870_v31 = vand.u32 4294901760, %v5435_v43  ;;  %v7875_v43 = vand.u32 4294901760, %v5508_v49  ;;  %v228_v49 = vld [vmem:[%s7417_s1 + $0x270] sm:$0xff] }
  0xc0   : > { %4132 = vmatprep.subr.mxu1 %v7863_v32  ;;  %4143 = vmatprep.subr.mxu0 %v7864_v57  ;;  %v243_v57 = vld [vmem:[%s7417_s1 + $0x2e8] sm:$0xff] }
  0xc1   : > { %4133 = vmatpush3.msra.mxu1 %v5727_v56  ;;  %4144 = vmatpush3.msra.mxu0 %v7865_v47  ;;  %v7872_v47 = vand.u32 4294901760, %v5497_v38  ;;  %v7876_v38 = vand.u32 4294901760, %v5569_v63  ;;  %v7879_v63 = vand.u32 4294901760, %v7845_v39  ;;  %v6052_v39 = vand.u32 4294901760, %v243_v57 }
  0xc2   : > { %4134 = vmatprep.subr.mxu1 %v5792_v7  ;;  %4145 = vmatprep.subr.mxu0 %v7866_v53 }
  0xc3   : > { %4135 = vmatpush3.msra.mxu1 %v5803_v52  ;;  %4146 = vmatpush3.msra.mxu0 %v7867_v60  ;;  %v7891_v60 = vand.u32 4294901760, %v5796_v45  ;;  %v240_v45 = vld [vmem:[%s7417_s1 + $0x2d0] sm:$0xff] }
  0xc4   : > { %4136 = vmatprep.subr.mxu1 %v5809_v36  ;;  %4147 = vmatprep.subr.mxu0 %v7868_v30 }
  0xc5   : > { %4137 = vmatpush3.msra.mxu1 %v5811_v61  ;;  %1721 = vmatprep.mubr.f32.mxu1 %v7869_v58  ;;  %v6092_v58 = vsub.f32 %v243_v57, %v6052_v39 }
  0xc6   : > { %4148 = vmatpush3.msra.mxu0 %v7870_v31  ;;  %1725 = vmatmul.mubr.f32.vlgmr.msra.gmra.mxu1 %v7871_v25 }
  0xc7   : > { %4149 = vmatprep.subr.mxu0 %v7872_v47  ;;  %4176 = vmatprep.subr.mxu1 %v5340_v42  ;;  %v229_v42 = vld [vmem:[%s7417_s1 + $0x278] sm:$0xff] }
  0xc8   : > { %4150 = vmatpush3.msra.mxu0 %v7873_v62  ;;  %4177 = vmatpush3.msra.mxu1 %v5342_v55  ;;  %v7877_v55 = vand.u32 4294901760, %v7841_v41  ;;  %v6011_v21 = vand.u32 4294901760, %v229_v42  ;;  %v7883_v41 = vand.u32 4294901760, %v7850_v46 }
  0xc9   : > { %4151 = vmatprep.subr.mxu0 %v7874_v8  ;;  %4178 = vmatprep.subr.mxu1 %v5364_v28  ;;  %v7878_v28 = vand.u32 4294901760, %v7843_v6  ;;  %v6044_v6 = vand.u32 4294901760, %v244_v9 }
  0xca   : > { %4152 = vmatpush3.msra.mxu0 %v7875_v43  ;;  %4179 = vmatpush3.msra.mxu1 %v5353_v16  ;;  %v245_v16 = vld [vmem:[%s7417_s1 + $0x2f8] sm:$0xff]  ;;  %v7897_v43 = vand.u32 4294901760, %v5776_v44  ;;  %v6133_v44 = vand.u32 4294901760, %v240_v45 }
  0xcb   : > { %4153 = vmatprep.subr.mxu0 %v7876_v38  ;;  %4180 = vmatprep.subr.mxu1 %v7840_v18  ;;  %v6025_v24 = vand.u32 4294901760, %v245_v16  ;;  %v6033_v18 = vand.u32 4294901760, %v228_v49  ;;  %v6084_v53 = vsub.f32 %v244_v9, %v6044_v6 }
  0xcc   : > { %4154 = vmatpush3.msra.mxu0 %v7877_v55  ;;  %4181 = vmatpush3.msra.mxu1 %v7842_v11  ;;  %v6042_v11 = vsub.f32 %v229_v42, %v6011_v21  ;;  %v7898_v42 = vand.u32 4294901760, %v5829_v14  ;;  %v7899_v55 = vld [vmem:[#allocation15_spill] sm:$0xff]  ;;  %7900 = vst [vmem:[#allocation19_spill] sm:$0xff] %v6133_v44  ;;  %v222_v14 = vld [vmem:[%s7417_s1 + $0x240] sm:$0xff] }
  0xcd   : > { %4155 = vmatprep.subr.mxu0 %v7878_v28  ;;  %4182 = vmatprep.subr.mxu1 %v7844_v22  ;;  %v7884_v22 = vand.u32 4294901760, %v5730_v26  ;;  %v7887_v26 = vand.u32 4294901760, %v5755_v12  ;;  %v6069_v46 = vsub.f32 %v228_v49, %v6033_v18  ;;  %v241_v12 = vld [vmem:[%s7417_s1 + $0x2d8] sm:$0xff]  ;;  %v7902_v49 = vand.u32 4294901760, %v5833_v20 }
  0xce   : > { %4156 = vmatpush3.msra.mxu0 %v7879_v63  ;;  %4183 = vmatpush3.msra.mxu1 %v7846_v1  ;;  %v7885_v1 = vand.u32 4294901760, %v5679_v34  ;;  %v6071_v34 = vand.u32 4294901760, %v226_v40  ;;  %v6115_v62 = vand.u32 4294901760, %v241_v12 }
  0xcf   : > { %4157 = vmatprep.subr.mxu0 %v7880_v5  ;;  %4184 = vmatprep.subr.mxu1 %v7847_v33  ;;  %v6057_v33 = vand.u32 4294901760, %v227_v54  ;;  %v7559_v8 = vand.u32 4294901760, %v6069_v46  ;;  %v7903_v5 = vld [vmem:[#allocation14_spill] sm:$0xff] }
  0xd0   : > { %4158 = vmatpush3.msra.mxu0 %v7881_v19  ;;  %4185 = vmatpush3.msra.mxu1 %v7848_v17  ;;  %v242_v17 = vld [vmem:[%s7417_s1 + $0x2e0] sm:$0xff]  ;;  %7888 = vst [vmem:[#allocation16_spill] sm:$0xff] %v6071_v34  ;;  %7896 = vst [vmem:[#allocation4_spill] sm:$0xff] %v6115_v62 }
  0xd1   : > { %4159 = vmatprep.subr.mxu0 %v7882_v0  ;;  %4186 = vmatprep.subr.mxu1 %v7849_v51  ;;  %7886 = vst [vmem:[#allocation3_spill] sm:$0xff] %v6057_v33  ;;  %v6063_v51 = vsub.f32 %v245_v16, %v6025_v24  ;;  %v6089_v30 = vand.u32 4294901760, %v242_v17  ;;  %v6098_v31 = vsub.f32 %v227_v54, %v6057_v33  ;;  %v7558_v16 = vand.u32 4294901760, %v6092_v58  ;;  %v7904_v0 = vld [vmem:[#allocation30_spill] sm:$0xff] }
  0xd2   : > { %4160 = vmatpush3.msra.mxu0 %v7883_v41  ;;  %4187 = vmatpush3.msra.mxu1 %v7851_v37  ;;  %v225_v37 = vld [vmem:[%s7417_s1 + $0x258] sm:$0xff]  ;;  %v7905_v54 = vand.u32 4294901760, %v7904_v0  ;;  %v6165_v20 = vsub.f32 %v6069_v46, %v7559_v8 }
  0xd3   : > { %4161 = vmatprep.subr.mxu0 %v7884_v22  ;;  %4188 = vmatprep.subr.mxu1 %v7852_v2  ;;  %v7889_v2 = vld [vmem:[#allocation22_spill] sm:$0xff]  ;;  %7892 = vst [vmem:[#allocation2_spill] sm:$0xff] %v6089_v30  ;;  %v7563_v25 = vand.u32 4294901760, %v6063_v51  ;;  %v6101_v47 = vand.u32 4294901760, %v225_v37  ;;  %v6142_v63 = vsub.f32 %v242_v17, %v6089_v30  ;;  %v7557_v57 = vand.u32 4294901760, %v6098_v31  ;;  %v7907_v17 = vld [vmem:[#allocation29_spill] sm:$0xff] }
  0xd4   : > { %4162 = vmatpush3.msra.mxu0 %v7885_v1  ;;  %4189 = vmatpush3.msra.mxu1 %v7853_v15  ;;  %v7890_v15 = vand.u32 4294901760, %v7889_v2  ;;  %v6174_v1 = vsub.f32 %v241_v12, %v6115_v62  ;;  %v7913_v12 = vld [vmem:[#allocation27_spill] sm:$0xff] }
  0xd5   : > { %4163 = vmatprep.subr.mxu0 %v7887_v26  ;;  %4190 = vmatprep.subr.mxu1 %v7854_v27  ;;  %v7562_v27 = vand.u32 4294901760, %v6042_v11  ;;  %7894 = vst [vmem:[#allocation13_spill] sm:$0xff] %v6101_v47  ;;  %v6153_v9 = vsub.f32 %v6063_v51, %v7563_v25  ;;  %v6156_v19 = vsub.f32 %v225_v37, %v6101_v47  ;;  %v7908_v26 = vand.u32 4294901760, %v7907_v17  ;;  %v237_v17 = vld [vmem:[%s7417_s1 + $0x2b8] sm:$0xff] }
  0xd6   : > { %4164 = vmatpush3.msra.mxu0 %v7890_v15  ;;  %4191 = vmatpush3.msra.mxu1 %v7855_v48  ;;  %v7893_v48 = vand.u32 4294901760, %v5763_v3  ;;  %v7895_v3 = vand.u32 4294901760, %v5815_v10  ;;  %v7561_v10 = vand.u32 4294901760, %v6084_v53  ;;  %v6262_v8 = vand.u32 4294901760, %v237_v17 }
  0xd7   : > { %4165 = vmatprep.subr.mxu0 %v7891_v60  ;;  %4192 = vmatprep.subr.mxu1 %v7856_v35  ;;  %v224_v35 = vld [vmem:[%s7417_s1 + $0x250] sm:$0xff]  ;;  %v6124_v38 = vsub.f32 %v6042_v11, %v7562_v27  ;;  %v6187_v60 = vand.u32 4294901760, %v222_v14 }
  0xd8   : > { %4166 = vmatpush3.msra.mxu0 %v7893_v48  ;;  %4193 = vmatpush3.msra.mxu1 %v7857_v13  ;;  %v6113_v13 = vsub.f32 %v226_v40, %v6071_v34  ;;  %v6135_v28 = vand.u32 4294901760, %v224_v35  ;;  %v238_v40 = vld [vmem:[%s7417_s1 + $0x2c0] sm:$0xff]  ;;  %v6183_v2 = vsub.f32 %v6084_v53, %v7561_v10  ;;  %v7912_v48 = vld [vmem:[#allocation25_spill] sm:$0xff]  ;;  %7918 = vst [vmem:[#allocation11_spill] sm:$0xff] %v6262_v8  ;;  %v219_v10 = vld [vmem:[%s7417_s1 + $0x228] sm:$0xff] }
  0xd9   : > { %4167 = vmatprep.subr.mxu0 %v7895_v3  ;;  %4194 = vmatprep.subr.mxu1 %v7858_v4  ;;  %v223_v4 = vld [vmem:[%s7417_s1 + $0x248] sm:$0xff]  ;;  %7911 = vst [vmem:[#allocation8_spill] sm:$0xff] %v6187_v60  ;;  %v6214_v0 = vand.u32 4294901760, %v238_v40 }
  0xda   : > { %4168 = vmatpush3.msra.mxu0 %v7897_v43  ;;  %4195 = vmatpush3.msra.mxu1 %v7859_v59  ;;  %7901 = vst [vmem:[#allocation20_spill] sm:$0xff] %v6135_v28  ;;  %v239_v59 = vld [vmem:[%s7417_s1 + $0x2c8] sm:$0xff]  ;;  %v6167_v41 = vand.u32 4294901760, %v223_v4  ;;  %v7556_v22 = vand.u32 4294901760, %v6113_v13  ;;  %v6192_v3 = vsub.f32 %v224_v35, %v6135_v28  ;;  %v6197_v43 = vsub.f32 %v6092_v58, %v7558_v16 }
  0xdb   : > { %4169 = vmatprep.subr.mxu0 %v7898_v42  ;;  %4196 = vmatprep.subr.mxu1 %v7899_v55  ;;  %v6185_v15 = vand.u32 4294901760, %v239_v59  ;;  %v7560_v42 = vand.u32 4294901760, %v6142_v63  ;;  %v221_v55 = vld [vmem:[%s7417_s1 + $0x238] sm:$0xff]  ;;  %v2231_v35 = vand.u32 4294901760, %v6153_v9  ;;  %7914 = vst [vmem:[#allocation21_spill] sm:$0xff] %v6214_v0  ;;  %v6273_v27 = vsub.f32 %v238_v40, %v6214_v0 }
  0xdc   : > { %4170 = vmatpush3.msra.mxu0 %v7902_v49  ;;  %4197 = vmatpush3.msra.mxu1 %v7903_v5  ;;  %7906 = vst [vmem:[#allocation5_spill] sm:$0xff] %v6167_v41  ;;  %v6204_v49 = vsub.f32 %v240_v45, %v6133_v44  ;;  %v6212_v5 = vsub.f32 %v6098_v31, %v7557_v57 }
  0xdd   : > { %4171 = vmatprep.subr.mxu0 %v7905_v54  ;;  %4198 = vmatprep.subr.mxu1 %v5663_v29  ;;  %v7909_v29 = vld [vmem:[#allocation26_spill] sm:$0xff]  ;;  %7910 = vst [vmem:[#allocation6_spill] sm:$0xff] %v6185_v15  ;;  %v7564_v54 = vand.u32 4294901760, %v6156_v19  ;;  %v6226_v9 = vsub.f32 %v6113_v13, %v7556_v22  ;;  %v220_v22 = vld [vmem:[%s7417_s1 + $0x230] sm:$0xff]  ;;  %v6244_v57 = vsub.f32 %v239_v59, %v6185_v15  ;;  %v7567_v59 = vand.u32 4294901760, %v6192_v3 }
  0xde   : > { %4172 = vmatpush3.msra.mxu0 %v7908_v26  ;;  %1891 = vmatprep.mubr.f32.mxu0 %v7909_v29  ;;  %v7565_v26 = vand.u32 4294901760, %v6174_v1  ;;  %v7566_v16 = vand.u32 4294901760, %v6204_v49  ;;  %7919 = vst [vmem:[#allocation12_spill] sm:$0xff] %v6273_v27 }
  0xdf   : > { %4199 = vmatpush3.msra.mxu1 %v7912_v48  ;;  %1893 = vmatmul.mubr.f32.vlgmr.msra.gmra.mxu0 %v7913_v12  ;;  %v6238_v48 = vand.u32 4294901760, %v221_v55 }
  0xe0   : > { %4200 = vmatprep.subr.mxu1 %v5739_v23  ;;  %4211 = vmatprep.subr.mxu0 %v6025_v24  ;;  %v6221_v23 = vsub.f32 %v223_v4, %v6167_v41  ;;  %v6236_v4 = vsub.f32 %v222_v14, %v6187_v60  ;;  %v6252_v14 = vsub.f32 %v6142_v63, %v7560_v42 }
  0xe1   : > { %4201 = vmatpush3.msra.mxu1 %v5716_v50  ;;  %4212 = vmatpush3.msra.mxu0 %v6011_v21  ;;  %v2238_v50 = vand.u32 4294901760, %v6183_v2  ;;  %7917 = vst [vmem:[#allocation9_spill] sm:$0xff] %v6238_v48  ;;  %v236_v2 = vld [vmem:[%s7417_s1 + $0x2b0] sm:$0xff]  ;;  %v6267_v42 = vsub.f32 %v6156_v19, %v7564_v54  ;;  %v6281_v25 = vsub.f32 %v6174_v1, %v7565_v26  ;;  %v6283_v54 = vand.u32 4294901760, %v220_v22 }
  0xe2   : > { %7915 = vst [vmem:[#allocation7_spill] sm:$0xff] %v6221_v23  ;;  %4202 = vmatprep.subr.mxu1 %v7863_v32  ;;  %4213 = vmatprep.subr.mxu0 %v6044_v6  ;;  %7916 = vst [vmem:[#allocation10_spill] sm:$0xff] %v6236_v4  ;;  %v6297_v26 = vand.u32 4294901760, %v236_v2  ;;  %v2252_v37 = vand.u32 4294901760, %v6252_v14  ;;  %v6314_v32 = vand.u32 4294901760, %v219_v10 }
  0xe3   : > { %4203 = vmatpush3.msra.mxu1 %v5727_v56  ;;  %4214 = vmatpush3.msra.mxu0 %v6033_v18  ;;  %7920 = vst [vmem:[#allocation17_spill] sm:$0xff] %v6283_v54  ;;  %v235_v56 = vld [vmem:[%s7417_s1 + $0x2a8] sm:$0xff]  ;;  %v2259_v45 = vand.u32 4294901760, %v6281_v25  ;;  %v6330_v40 = vsub.f32 %v220_v22, %v6283_v54  ;;  %v7928_v25 = vand.u32 4294901760, %v6124_v38  ;;  %v7929_v22 = vand.u32 4294901760, %v6244_v57 }
  0xe4   : > { %4204 = vmatprep.subr.mxu1 %v5792_v7  ;;  %4215 = vmatprep.subr.mxu0 %v6052_v39  ;;  %v6295_v7 = vsub.f32 %v221_v55, %v6238_v48  ;;  %7922 = vst [vmem:[#allocation24_spill] sm:$0xff] %v6297_v26  ;;  %v6312_v55 = vsub.f32 %v6192_v3, %v7567_v59  ;;  %7923 = vst [vmem:[#allocation23_spill] sm:$0xff] %v6314_v32  ;;  %v6322_v14 = vand.u32 4294901760, %v235_v56 }
  0xe5   : > { %4205 = vmatpush3.msra.mxu1 %v5803_v52  ;;  %4216 = vmatpush3.msra.mxu0 %v6057_v33  ;;  %v218_v52 = vld [vmem:[%s7417_s1 + $0x220] sm:$0xff]  ;;  %v7931_v33 = vand.u32 4294901760, %v6165_v20 }
  0xe6   : > { %4206 = vmatprep.subr.mxu1 %v5809_v36  ;;  %4217 = vmatprep.subr.mxu0 %v6089_v30  ;;  %7921 = vst [vmem:[#allocation18_spill] sm:$0xff] %v6295_v7  ;;  %v6307_v36 = vsub.f32 %v6204_v49, %v7566_v16  ;;  %7924 = vst [vmem:[#allocation28_spill] sm:$0xff] %v6322_v14  ;;  %v6325_v59 = vand.u32 4294901760, %v218_v52  ;;  %v217_v16 = vld [vmem:[%s7417_s1 + $0x218] sm:$0xff]  ;;  %v147_v30 = vld [vmem:[%s5061_s25 + $0x28] sm:$0xff] }
  0xe7   : > { %4207 = vmatpush3.msra.mxu1 %v5811_v61  ;;  %1995 = vmatprep.mubr.f32.mxu1 %v7909_v29  ;;  %v234_v61 = vld [vmem:[%s7417_s1 + $0x2a0] sm:$0xff]  ;;  %v6338_v29 = vsub.f32 %v237_v17, %v6262_v8  ;;  %v7930_v17 = vand.u32 4294901760, %v6236_v4 }
  0xe8   : > { %4218 = vmatpush3.msra.mxu0 %v6071_v34  ;;  %1997 = vmatmul.mubr.f32.vlgmr.msra.gmra.mxu1 %v7913_v12  ;;  %7925 = vst [vmem:[#allocation22_spill] sm:$0xff] %v6325_v59  ;;  %v7926_v34 = vand.u32 4294901760, %v6221_v23  ;;  %v2266_v38 = vand.u32 4294901760, %v6307_v36 }
  0xe9   : > { %4219 = vmatprep.subr.mxu0 %v6115_v62  ;;  %4246 = vmatprep.subr.mxu1 %v2231_v35  ;;  %7927 = vst [vmem:[#allocation15_spill] sm:$0xff] %v6338_v29  ;;  %v6350_v35 = vsub.f32 %v6244_v57, %v7929_v22  ;;  %v6357_v62 = vsub.f32 %v6236_v4, %v7930_v17 }
  0xea   : > { %v6335_v12 = vsub.f32 %v6221_v23, %v7926_v34  ;;  %4220 = vmatpush3.msra.mxu0 %v6101_v47  ;;  %4247 = vmatpush3.msra.mxu1 %v7928_v25  ;;  %v6352_v34 = vand.u32 4294901760, %v234_v61  ;;  %v146_v23 = vld [vmem:[%s5061_s25 + $0x20] sm:$0xff]  ;;  %v2154_v25 = vand.u32 4294901760, %v6312_v55  ;;  %v6365_v22 = vsub.f32 %v219_v10, %v6314_v32  ;;  %v233_v47 = vld [vmem:[%s7417_s1 + $0x298] sm:$0xff] }
  0xeb   : > { %4221 = vmatprep.subr.mxu0 %v6133_v44  ;;  %4248 = vmatprep.subr.mxu1 %v2238_v50  ;;  %v6371_v17 = vsub.f32 %v236_v2, %v6297_v26  ;;  %v7932_v50 = vand.u32 4294901760, %v6273_v27  ;;  %v6382_v10 = vsub.f32 %v218_v52, %v6325_v59  ;;  %v6384_v55 = vand.u32 4294901760, %v217_v16  ;;  %v216_v2 = vld [vmem:[%s7417_s1 + $0x210] sm:$0xff] }
  0xec   : > { %4222 = vmatpush3.msra.mxu0 %v6135_v28  ;;  %4249 = vmatpush3.msra.mxu1 %v7931_v33  ;;  %v6389_v44 = vand.u32 4294901760, %v147_v30  ;;  %v7934_v33 = vand.u32 4294901760, %v6197_v43  ;;  %v2161_v20 = vand.u32 4294901760, %v6335_v12  ;;  %v232_v52 = vld [vmem:[%s7417_s1 + $0x290] sm:$0xff]  ;;  %v6400_v28 = vsub.f32 %v235_v56, %v6322_v14  ;;  %v231_v56 = vld [vmem:[%s7417_s1 + $0x288] sm:$0xff] }
  0xed   : > { %v6379_v36 = vsub.f32 %v6273_v27, %v7932_v50  ;;  %4223 = vmatprep.subr.mxu0 %v6185_v15  ;;  %v6402_v4 = vand.u32 4294901760, %v146_v23  ;;  %v7936_v15 = vand.u32 4294901760, %v6212_v5  ;;  %v2273_v43 = vand.u32 4294901760, %v6350_v35  ;;  %v215_v35 = vld [vmem:[%s7417_s1 + $0x208] sm:$0xff] }
  0xee   : > { %7933 = vst [vmem:[#allocation14_spill] sm:$0xff] %v6389_v44  ;;  %4250 = vmatprep.subr.mxu1 %v7934_v33  ;;  %4224 = vmatpush3.msra.mxu0 %v6167_v41  ;;  %v2168_v12 = vand.u32 4294901760, %v6357_v62  ;;  %v6409_v33 = vand.u32 4294901760, %v233_v47  ;;  %v7937_v50 = vand.u32 4294901760, %v6295_v7  ;;  %v6421_v5 = vand.u32 4294901760, %v216_v2 }
  0xef   : > { %7935 = vst [vmem:[#allocation30_spill] sm:$0xff] %v6402_v4  ;;  %4251 = vmatpush3.msra.mxu1 %v7936_v15  ;;  %4225 = vmatprep.subr.mxu0 %v6214_v0  ;;  %v7938_v41 = vand.u32 4294901760, %v6226_v9  ;;  %v6435_v15 = vsub.f32 %v217_v16, %v6384_v55  ;;  %v6437_v0 = vand.u32 4294901760, %v232_v52  ;;  %v6440_v62 = vsub.f32 %v147_v30, %v6389_v44  ;;  %v230_v16 = vld [vmem:[%s7417_s1 + $0x280] sm:$0xff] }
  0xf0   : > { %v6414_v27 = vsub.f32 %v6295_v7, %v7937_v50  ;;  %4252 = vmatprep.subr.mxu1 %v2252_v37  ;;  %v6428_v50 = vsub.f32 %v234_v61, %v6352_v34  ;;  %4226 = vmatpush3.msra.mxu0 %v6187_v60  ;;  %v2280_v37 = vand.u32 4294901760, %v6379_v36  ;;  %v7940_v61 = vand.u32 4294901760, %v6338_v29  ;;  %v214_v30 = vld [vmem:[%s7417_s1 + $0x200] sm:$0xff] }
  0xf1   : > { %4253 = vmatpush3.msra.mxu1 %v7938_v41  ;;  %7939 = vst [vmem:[#allocation29_spill] sm:$0xff] %v6437_v0  ;;  %4227 = vmatprep.subr.mxu0 %v6262_v8  ;;  %v6446_v7 = vand.u32 4294901760, %v231_v56  ;;  %v6456_v9 = vsub.f32 %v146_v23, %v6402_v4  ;;  %v6466_v8 = vsub.f32 %v233_v47, %v6409_v33  ;;  %v7942_v23 = vand.u32 4294901760, %v6371_v17 }
  0xf2   : > { %4254 = vmatprep.subr.mxu1 %v2259_v45  ;;  %v2286_v60 = vsub.f32 %v6338_v29, %v7940_v61  ;;  %4228 = vmatpush3.msra.mxu0 %v6238_v48  ;;  %v7941_v45 = vand.u32 4294901760, %v6267_v42  ;;  %v2175_v36 = vand.u32 4294901760, %v6414_v27  ;;  %v6462_v61 = vand.u32 4294901760, %v215_v35 }
  0xf3   : > { %4229 = vmatprep.subr.mxu0 %v6297_v26  ;;  %v2293_v29 = vsub.f32 %v6371_v17, %v7942_v23  ;;  %v6473_v48 = vsub.f32 %v216_v2, %v6421_v5  ;;  %v7943_v42 = vand.u32 4294901760, %v6330_v40  ;;  %v6480_v47 = vand.u32 4294901760, %v230_v16  ;;  %2339 = vmatprep.mubr.f32.mxu1 %v6389_v44  ;;  %v7977_v44 = vld [vmem:[#allocation28_spill] sm:$0xff] }
  0xf4   : > { %4255 = vmatpush3.msra.mxu1 %v7941_v45  ;;  %4230 = vmatpush3.msra.mxu0 %v6283_v54  ;;  %v6482_v41 = vand.u32 4294901760, %v214_v30  ;;  %v6486_v23 = vsub.f32 %v232_v52, %v6437_v0  ;;  %v2287_v2 = vand.u32 4294901760, %v2286_v60  ;;  %v7945_v52 = vand.u32 4294901760, %v6365_v22 }
  0xf5   : > { %4256 = vmatprep.subr.mxu1 %v2266_v38  ;;  %v2181_v27 = vsub.f32 %v6330_v40, %v7943_v42  ;;  %4231 = vmatprep.subr.mxu0 %v6322_v14  ;;  %v7944_v42 = vand.u32 4294901760, %v6400_v28  ;;  %v6496_v38 = vsub.f32 %v215_v35, %v6462_v61  ;;  %v7946_v54 = vand.u32 4294901760, %v6428_v50 }
  0xf6   : > { %4257 = vmatpush3.msra.mxu1 %v2154_v25  ;;  %4232 = vmatpush3.msra.mxu0 %v6314_v32  ;;  %v2188_v14 = vsub.f32 %v6365_v22, %v7945_v52  ;;  %v6512_v52 = vsub.f32 %v214_v30, %v6482_v41  ;;  %v7951_v30 = vand.u32 4294901760, %v6456_v9 }
  0xf7   : > { %4258 = vmatprep.subr.mxu1 %v2273_v43  ;;  %v2300_v45 = vsub.f32 %v6400_v28, %v7944_v42  ;;  %v6503_v43 = vsub.f32 %v231_v56, %v6446_v7  ;;  %4233 = vmatprep.subr.mxu0 %v6352_v34  ;;  %v2294_v42 = vand.u32 4294901760, %v2293_v29  ;;  %v2182_v25 = vand.u32 4294901760, %v2181_v27 }
  0xf8   : > { %4259 = vmatpush3.msra.mxu1 %v2161_v20  ;;  %v2307_v20 = vsub.f32 %v6428_v50, %v7946_v54  ;;  %4234 = vmatpush3.msra.mxu0 %v6325_v59  ;;  %7947 = vst [vmem:[#allocation26_spill] sm:$0xff] %v6512_v52  ;;  %v7948_v56 = vand.u32 4294901760, %v6440_v62  ;;  %v6519_v29 = vsub.f32 %v230_v16, %v6480_v47  ;;  %v7950_v27 = vand.u32 4294901760, %v6382_v10 }
  0xf9   : > { %4260 = vmatprep.subr.mxu1 %v2280_v37  ;;  %4235 = vmatprep.subr.mxu0 %v6409_v33  ;;  %v2301_v54 = vand.u32 4294901760, %v2300_v45  ;;  %v2107_v35 = vsub.f32 %v6456_v9, %v7951_v30  ;;  %v7952_v16 = vand.u32 4294901760, %v6466_v8  ;;  %v7612_v59 = vand.u32 4294901760, %v6512_v52 }
  0xfa   : > { %4261 = vmatpush3.msra.mxu1 %v2168_v12  ;;  %v2101_v60 = vsub.f32 %v6440_v62, %v7948_v56  ;;  %7949 = vst [vmem:[#allocation25_spill] sm:$0xff] %v6519_v29  ;;  %v2195_v12 = vsub.f32 %v6382_v10, %v7950_v27  ;;  %4236 = vmatpush3.msra.mxu0 %v6384_v55  ;;  %v2189_v56 = vand.u32 4294901760, %v2188_v14  ;;  %v7953_v27 = vand.u32 4294901760, %v6435_v15 }
  0xfb   : > { %4262 = vmatprep.subr.mxu1 %v2287_v2  ;;  %v2314_v37 = vsub.f32 %v6466_v8, %v7952_v16  ;;  %4237 = vmatprep.subr.mxu0 %v6437_v0  ;;  %v2308_v2 = vand.u32 4294901760, %v2307_v20  ;;  %v7613_v45 = vand.u32 4294901760, %v6519_v29  ;;  %v2108_v20 = vand.u32 4294901760, %v2107_v35 }
  0xfc   : > { %4263 = vmatpush3.msra.mxu1 %v2175_v36  ;;  %v2202_v30 = vsub.f32 %v6435_v15, %v7953_v27  ;;  %4238 = vmatpush3.msra.mxu0 %v6421_v5  ;;  %v2102_v14 = vand.u32 4294901760, %v2101_v60  ;;  %v7954_v36 = vand.u32 4294901760, %v6486_v23  ;;  %v7955_v0 = vand.u32 4294901760, %v6473_v48 }
  0xfd   : > { %4264 = vmatprep.subr.mxu1 %v2294_v42  ;;  %4239 = vmatprep.subr.mxu0 %v6446_v7  ;;  %v2196_v42 = vand.u32 4294901760, %v2195_v12  ;;  %v7956_v60 = vand.u32 4294901760, %v6503_v43  ;;  %v7957_v35 = vand.u32 4294901760, %v6496_v38 }
  0xfe   : > { %4265 = vmatpush3.msra.mxu1 %v2182_v25  ;;  %v2321_v16 = vsub.f32 %v6486_v23, %v7954_v36  ;;  %v2209_v27 = vsub.f32 %v6473_v48, %v7955_v0  ;;  %4240 = vmatpush3.msra.mxu0 %v6462_v61  ;;  %v2315_v25 = vand.u32 4294901760, %v2314_v37  ;;  %v2335_v37 = vsub.f32 %v6519_v29, %v7613_v45  ;;  %v7975_v45 = vld [vmem:[#allocation9_spill] sm:$0xff] }
  0xff   : > { %4266 = vmatprep.subr.mxu1 %v2301_v54  ;;  %v2328_v36 = vsub.f32 %v6503_v43, %v7956_v60  ;;  %4241 = vmatprep.subr.mxu0 %v6480_v47  ;;  %v2203_v54 = vand.u32 4294901760, %v2202_v30  ;;  %v2216_v12 = vsub.f32 %v6496_v38, %v7957_v35  ;;  %v7961_v60 = vld [vmem:[#allocation2_spill] sm:$0xff]  ;;  %v7964_v35 = vld [vmem:[#allocation15_spill] sm:$0xff] }
 0x100   : > { %4267 = vmatpush3.msra.mxu1 %v2189_v56  ;;  %4242 = vmatpush3.msra.mxu0 %v6482_v41  ;;  %v2322_v0 = vand.u32 4294901760, %v2321_v16  ;;  %v2210_v56 = vand.u32 4294901760, %v2209_v27  ;;  %v2336_v16 = vand.u32 4294901760, %v2335_v37  ;;  %v7959_v27 = vld [vmem:[#allocation3_spill] sm:$0xff]  ;;  %v7967_v37 = vld [vmem:[#allocation13_spill] sm:$0xff] }
 0x101   : > { %4268 = vmatprep.subr.mxu1 %v2308_v2  ;;  %2103 = vmatprep.mubr.f32.mxu0 %v2102_v14  ;;  %v2223_v2 = vsub.f32 %v6512_v52, %v7612_v59  ;;  %v2329_v30 = vand.u32 4294901760, %v2328_v36  ;;  %v2217_v14 = vand.u32 4294901760, %v2216_v12  ;;  %v7962_v36 = vld [vmem:[#allocation10_spill] sm:$0xff]  ;;  %v7965_v12 = vld [vmem:[#allocation4_spill] sm:$0xff]  ;;  %v7974_v59 = vld [vmem:[#allocation11_spill] sm:$0xff] }
 0x102   : > { %4269 = vmatpush3.msra.mxu1 %v2196_v42  ;;  %2109 = vmatmul.mubr.f32.vlgmr.msra.gmra.mxu0 %v2108_v20  ;;  %v7958_v20 = vld [vmem:[#allocation7_spill] sm:$0xff] }
 0x103   : > { %4270 = vmatprep.subr.mxu1 %v2315_v25  ;;  %4281 = vmatprep.subr.mxu0 %v6063_v51  ;;  %v2224_v42 = vand.u32 4294901760, %v2223_v2  ;;  %v7960_v25 = vld [vmem:[#allocation12_spill] sm:$0xff] }
 0x104   : > { %4271 = vmatpush3.msra.mxu1 %v2203_v54  ;;  %4282 = vmatpush3.msra.mxu0 %v6042_v11  ;;  %v7963_v54 = vld [vmem:[#allocation16_spill] sm:$0xff] }
 0x105   : > { %4272 = vmatprep.subr.mxu1 %v2322_v0  ;;  %4283 = vmatprep.subr.mxu0 %v6084_v53  ;;  %v7966_v0 = vld [vmem:[#allocation18_spill] sm:$0xff]  ;;  %v7969_v2 = vld [vmem:[#allocation20_spill] sm:$0xff] }
 0x106   : > { %4273 = vmatpush3.msra.mxu1 %v2210_v56  ;;  %4284 = vmatpush3.msra.mxu0 %v6069_v46  ;;  %v7968_v56 = vld [vmem:[#allocation19_spill] sm:$0xff] }
 0x107   : > { %4274 = vmatprep.subr.mxu1 %v2329_v30  ;;  %4285 = vmatprep.subr.mxu0 %v6092_v58  ;;  %v7970_v30 = vld [vmem:[#allocation6_spill] sm:$0xff] }
 0x108   : > { %4275 = vmatpush3.msra.mxu1 %v2217_v14  ;;  %4286 = vmatpush3.msra.mxu0 %v6098_v31  ;;  %v7971_v14 = vld [vmem:[#allocation5_spill] sm:$0xff] }
 0x109   : > { %4276 = vmatprep.subr.mxu1 %v2336_v16  ;;  %4287 = vmatprep.subr.mxu0 %v6142_v63  ;;  %v7972_v16 = vld [vmem:[#allocation21_spill] sm:$0xff] }
 0x10a   : > { %4277 = vmatpush3.msra.mxu1 %v2224_v42  ;;  %4288 = vmatpush3.msra.mxu0 %v6113_v13  ;;  %v7973_v42 = vld [vmem:[#allocation8_spill] sm:$0xff] }
 0x10b   : > { %2341 = vmatmul.mubr.f32.vlgmr.msra.gmra.mxu1 %v6402_v4  ;;  %4289 = vmatprep.subr.mxu0 %v6174_v1  ;;  %v7976_v4 = vld [vmem:[#allocation17_spill] sm:$0xff] }
 0x10c   : > { %4316 = vmatprep.subr.mxu1 %v6025_v24  ;;  %4290 = vmatpush3.msra.mxu0 %v6156_v19 }
 0x10d   : > { %4317 = vmatpush3.msra.mxu1 %v6011_v21  ;;  %4291 = vmatprep.subr.mxu0 %v6204_v49 }
 0x10e   : > { %4318 = vmatprep.subr.mxu1 %v6044_v6  ;;  %4292 = vmatpush3.msra.mxu0 %v6192_v3 }
 0x10f   : > { %4319 = vmatpush3.msra.mxu1 %v6033_v18  ;;  %4293 = vmatprep.subr.mxu0 %v6244_v57 }
 0x110   : > { %4320 = vmatprep.subr.mxu1 %v6052_v39  ;;  %4294 = vmatpush3.msra.mxu0 %v7958_v20 }
 0x111   : > { %4321 = vmatpush3.msra.mxu1 %v7959_v27  ;;  %4295 = vmatprep.subr.mxu0 %v7960_v25 }
 0x112   : > { %4322 = vmatprep.subr.mxu1 %v7961_v60  ;;  %4296 = vmatpush3.msra.mxu0 %v7962_v36 }
 0x113   : > { %4323 = vmatpush3.msra.mxu1 %v7963_v54  ;;  %4297 = vmatprep.subr.mxu0 %v7964_v35 }
 0x114   : > { %4324 = vmatprep.subr.mxu1 %v7965_v12  ;;  %4298 = vmatpush3.msra.mxu0 %v7966_v0 }
 0x115   : > { %4325 = vmatpush3.msra.mxu1 %v7967_v37  ;;  %4299 = vmatprep.subr.mxu0 %v6371_v17 }
 0x116   : > { %4326 = vmatprep.subr.mxu1 %v7968_v56  ;;  %4300 = vmatpush3.msra.mxu0 %v6330_v40 }
 0x117   : > { %4327 = vmatpush3.msra.mxu1 %v7969_v2  ;;  %4301 = vmatprep.subr.mxu0 %v6400_v28 }
 0x118   : > { %4328 = vmatprep.subr.mxu1 %v7970_v30  ;;  %4302 = vmatpush3.msra.mxu0 %v6365_v22 }
 0x119   : > { %4329 = vmatpush3.msra.mxu1 %v7971_v14  ;;  %4303 = vmatprep.subr.mxu0 %v6428_v50 }
 0x11a   : > { %4330 = vmatprep.subr.mxu1 %v7972_v16  ;;  %4304 = vmatpush3.msra.mxu0 %v6382_v10 }
 0x11b   : > { %4331 = vmatpush3.msra.mxu1 %v7973_v42  ;;  %4305 = vmatprep.subr.mxu0 %v6466_v8 }
 0x11c   : > { %4332 = vmatprep.subr.mxu1 %v7974_v59  ;;  %4306 = vmatpush3.msra.mxu0 %v6435_v15 }
 0x11d   : > { %4333 = vmatpush3.msra.mxu1 %v7975_v45  ;;  %4307 = vmatprep.subr.mxu0 %v6486_v23 }
 0x11e   : > { %4334 = vmatprep.subr.mxu1 %v6297_v26  ;;  %4308 = vmatpush3.msra.mxu0 %v6473_v48  ;;  %v7978_v26 = vld [vmem:[#allocation22_spill] sm:$0xff] }
 0x11f   : > { %4335 = vmatpush3.msra.mxu1 %v7976_v4  ;;  %4309 = vmatprep.subr.mxu0 %v6503_v43 }
 0x120   : > { %4336 = vmatprep.subr.mxu1 %v7977_v44  ;;  %4310 = vmatpush3.msra.mxu0 %v6496_v38  ;;  %v7979_v44 = vand.u32 4294901760, %v6063_v51  ;;  %v7984_v51 = vand.u32 4294901760, %v6092_v58  ;;  %v7989_v58 = vand.u32 4294901760, %v6456_v9 }
 0x121   : > { %4337 = vmatpush3.msra.mxu1 %v6314_v32  ;;  %4311 = vmatprep.subr.mxu0 %v6519_v29  ;;  %v7980_v32 = vand.u32 4294901760, %v6042_v11  ;;  %v7981_v29 = vld [vmem:[#allocation29_spill] sm:$0xff]  ;;  %v7985_v11 = vand.u32 4294901760, %v6098_v31  ;;  %v7991_v31 = vand.u32 4294901760, %v6156_v19  ;;  %v276_v19 = vld [vmem:[%s7417_s1 + $0x3f0] sm:$0xff] }
 0x122   : > { %4338 = vmatprep.subr.mxu1 %v6352_v34  ;;  %4312 = vmatpush3.msra.mxu0 %v6512_v52  ;;  %v7982_v52 = vand.u32 4294901760, %v6084_v53  ;;  %v7986_v53 = vand.u32 4294901760, %v6142_v63  ;;  %v7992_v63 = vand.u32 4294901760, %v6204_v49  ;;  %v7999_v49 = vand.u32 4294901760, %v7966_v0 }
 0x123   : > { %2476 = vmatprep.mubr.f32.mxu0 %v6440_v62  ;;  %4339 = vmatpush3.msra.mxu1 %v7978_v26  ;;  %v7983_v26 = vand.u32 4294901760, %v6069_v46  ;;  %v7987_v46 = vand.u32 4294901760, %v6440_v62  ;;  %v260_v62 = vld [vmem:[%s7417_s1 + $0x370] sm:$0xff]  ;;  %v8005_v0 = vand.u32 4294901760, %v6428_v50 }
 0x124   : > { %2479 = vmatmul.mubr.f32.vlgmr.msra.gmra.mxu0 %v6456_v9  ;;  %4340 = vmatprep.subr.mxu1 %v6409_v33  ;;  %v275_v9 = vld [vmem:[%s7417_s1 + $0x3e8] sm:$0xff] }
 0x125   : > { %4351 = vmatprep.subr.mxu0 %v7979_v44  ;;  %4341 = vmatpush3.msra.mxu1 %v6384_v55  ;;  %v7988_v44 = vand.u32 4294901760, %v6113_v13  ;;  %v7993_v13 = vand.u32 4294901760, %v6192_v3 }
 0x126   : > { %4352 = vmatpush3.msra.mxu0 %v7980_v32  ;;  %4342 = vmatprep.subr.mxu1 %v7981_v29 }
 0x127   : > { %4353 = vmatprep.subr.mxu0 %v7982_v52  ;;  %4343 = vmatpush3.msra.mxu1 %v6421_v5  ;;  %v8000_v52 = vand.u32 4294901760, %v6371_v17  ;;  %v6715_v17 = vand.u32 4294901760, %v260_v62 }
 0x128   : > { %4354 = vmatpush3.msra.mxu0 %v7983_v26  ;;  %4344 = vmatprep.subr.mxu1 %v6446_v7  ;;  %v7990_v26 = vand.u32 4294901760, %v6174_v1  ;;  %v7994_v1 = vand.u32 4294901760, %v6244_v57  ;;  %v7998_v57 = vand.u32 4294901760, %v7964_v35 }
 0x129   : > { %4355 = vmatprep.subr.mxu0 %v7984_v51  ;;  %4345 = vmatpush3.msra.mxu1 %v6462_v61  ;;  %v8010_v51 = vand.u32 4294901760, %v6466_v8 }
 0x12a   : > { %4356 = vmatpush3.msra.mxu0 %v7985_v11  ;;  %4346 = vmatprep.subr.mxu1 %v6480_v47  ;;  %v272_v11 = vld [vmem:[%s7417_s1 + $0x3d0] sm:$0xff] }
 0x12b   : > { %4357 = vmatprep.subr.mxu0 %v7986_v53  ;;  %4347 = vmatpush3.msra.mxu1 %v6482_v41 }
 0x12c   : > { %2583 = vmatprep.mubr.f32.mxu1 %v7987_v46  ;;  %4358 = vmatpush3.msra.mxu0 %v7988_v44  ;;  %v8011_v46 = vand.u32 4294901760, %v6435_v15  ;;  %v271_v44 = vld [vmem:[%s7417_s1 + $0x3c8] sm:$0xff] }
 0x12d   : > { %2587 = vmatmul.mubr.f32.vlgmr.msra.gmra.mxu1 %v7989_v58  ;;  %4359 = vmatprep.subr.mxu0 %v7990_v26  ;;  %v8013_v58 = vand.u32 4294901760, %v6486_v23  ;;  %v8014_v26 = vld [vmem:[#allocation24_spill] sm:$0xff]  ;;  %v6797_v23 = vand.u32 4294901760, %v272_v11 }
 0x12e   : > { %4386 = vmatprep.subr.mxu1 %v6025_v24  ;;  %4360 = vmatpush3.msra.mxu0 %v7991_v31  ;;  %v7995_v24 = vand.u32 4294901760, %v7958_v20  ;;  %v6704_v20 = vand.u32 4294901760, %v276_v19 }
 0x12f   : > { %4387 = vmatpush3.msra.mxu1 %v6011_v21  ;;  %4361 = vmatprep.subr.mxu0 %v7992_v63  ;;  %v277_v21 = vld [vmem:[%s7417_s1 + $0x3f8] sm:$0xff]  ;;  %8018 = vst [vmem:[#allocation15_spill] sm:$0xff] %v6797_v23 }
 0x130   : > { %4388 = vmatprep.subr.mxu1 %v6044_v6  ;;  %4362 = vmatpush3.msra.mxu0 %v7993_v13  ;;  %v7996_v6 = vand.u32 4294901760, %v7960_v25  ;;  %v6688_v3 = vand.u32 4294901760, %v277_v21  ;;  %v259_v25 = vld [vmem:[%s7417_s1 + $0x368] sm:$0xff]  ;;  %v8017_v13 = vand.u32 4294901760, %v6473_v48 }
 0x131   : > { %4389 = vmatpush3.msra.mxu1 %v6033_v18  ;;  %4363 = vmatprep.subr.mxu0 %v7994_v1  ;;  %v261_v18 = vld [vmem:[%s7417_s1 + $0x378] sm:$0xff] }
 0x132   : > { %4390 = vmatprep.subr.mxu1 %v6052_v39  ;;  %4364 = vmatpush3.msra.mxu0 %v7995_v24  ;;  %v7997_v39 = vand.u32 4294901760, %v7962_v36  ;;  %v6693_v32 = vand.u32 4294901760, %v261_v18  ;;  %v6717_v36 = vand.u32 4294901760, %v275_v9  ;;  %v6726_v35 = vsub.f32 %v277_v21, %v6688_v3 }
 0x133   : > { %4391 = vmatpush3.msra.mxu1 %v7959_v27  ;;  %4365 = vmatprep.subr.mxu0 %v7996_v6  ;;  %v8001_v27 = vand.u32 4294901760, %v6330_v40  ;;  %v274_v40 = vld [vmem:[%s7417_s1 + $0x3e0] sm:$0xff]  ;;  %v8019_v21 = vand.u32 4294901760, %v6503_v43  ;;  %v8020_v6 = vld [vmem:[#allocation28_spill] sm:$0xff]  ;;  %v8022_v43 = vand.u32 4294901760, %v6496_v38 }
 0x134   : > { %4392 = vmatprep.subr.mxu1 %v7961_v60  ;;  %4366 = vmatpush3.msra.mxu0 %v7997_v39  ;;  %v8002_v60 = vand.u32 4294901760, %v6400_v28  ;;  %8003 = vst [vmem:[#allocation27_spill] sm:$0xff] %v6717_v36  ;;  %v8004_v28 = vand.u32 4294901760, %v6365_v22  ;;  %v8007_v22 = vand.u32 4294901760, %v6382_v10  ;;  %v6762_v10 = vsub.f32 %v260_v62, %v6715_v17 }
 0x135   : > { %4393 = vmatpush3.msra.mxu1 %v7963_v54  ;;  %4367 = vmatprep.subr.mxu0 %v7998_v57  ;;  %v258_v54 = vld [vmem:[%s7417_s1 + $0x360] sm:$0xff]  ;;  %v6769_v53 = vsub.f32 %v275_v9, %v6717_v36  ;;  %v8023_v57 = vld [vmem:[#allocation23_spill] sm:$0xff]  ;;  %v8024_v9 = vld [vmem:[#allocation25_spill] sm:$0xff] }
 0x136   : > { %4394 = vmatprep.subr.mxu1 %v7965_v12  ;;  %4368 = vmatpush3.msra.mxu0 %v7999_v49  ;;  %v6732_v12 = vsub.f32 %v261_v18, %v6693_v32  ;;  %v6750_v50 = vand.u32 4294901760, %v258_v54  ;;  %v6811_v18 = vand.u32 4294901760, %v271_v44 }
 0x137   : > { %4395 = vmatpush3.msra.mxu1 %v7967_v37  ;;  %4369 = vmatprep.subr.mxu0 %v8000_v52  ;;  %v6737_v37 = vand.u32 4294901760, %v259_v25  ;;  %v7623_v39 = vand.u32 4294901760, %v6769_v53  ;;  %v8025_v52 = vand.u32 4294901760, %v8024_v9 }
 0x138   : > { %4396 = vmatprep.subr.mxu1 %v7968_v56  ;;  %4370 = vmatpush3.msra.mxu0 %v8001_v27  ;;  %v273_v56 = vld [vmem:[%s7417_s1 + $0x3d8] sm:$0xff]  ;;  %8009 = vst [vmem:[#allocation12_spill] sm:$0xff] %v6750_v50  ;;  %v6795_v1 = vsub.f32 %v258_v54, %v6750_v50  ;;  %8021 = vst [vmem:[#allocation4_spill] sm:$0xff] %v6811_v18  ;;  %v8026_v54 = vld [vmem:[#allocation26_spill] sm:$0xff] }
 0x139   : > { %4397 = vmatpush3.msra.mxu1 %v7969_v2  ;;  %4371 = vmatprep.subr.mxu0 %v8002_v60  ;;  %8006 = vst [vmem:[#allocation7_spill] sm:$0xff] %v6737_v37  ;;  %v6743_v2 = vsub.f32 %v276_v19, %v6704_v20  ;;  %v6774_v8 = vand.u32 4294901760, %v273_v56  ;;  %v6784_v31 = vsub.f32 %v259_v25, %v6737_v37  ;;  %v255_v19 = vld [vmem:[%s7417_s1 + $0x348] sm:$0xff] }
 0x13a   : > { %4398 = vmatprep.subr.mxu1 %v7970_v30  ;;  %4372 = vmatpush3.msra.mxu0 %v8004_v28  ;;  %v6748_v30 = vand.u32 4294901760, %v274_v40  ;;  %v8027_v28 = vand.u32 4294901760, %v8026_v54 }
 0x13b   : > { %4399 = vmatpush3.msra.mxu1 %v7971_v14  ;;  %4373 = vmatprep.subr.mxu0 %v8005_v0  ;;  %v257_v14 = vld [vmem:[%s7417_s1 + $0x358] sm:$0xff]  ;;  %8012 = vst [vmem:[#allocation2_spill] sm:$0xff] %v6774_v8  ;;  %v6826_v62 = vsub.f32 %v273_v56, %v6774_v8  ;;  %v7622_v60 = vand.u32 4294901760, %v6784_v31  ;;  %v8028_v0 = vld [vmem:[#allocation14_spill] sm:$0xff]  ;;  %v6852_v56 = vand.u32 4294901760, %v255_v19 }
 0x13c   : > { %4400 = vmatprep.subr.mxu1 %v7972_v16  ;;  %4374 = vmatpush3.msra.mxu0 %v8007_v22  ;;  %8008 = vst [vmem:[#allocation3_spill] sm:$0xff] %v6748_v30  ;;  %v256_v16 = vld [vmem:[%s7417_s1 + $0x350] sm:$0xff]  ;;  %v6786_v15 = vand.u32 4294901760, %v257_v14  ;;  %v6800_v24 = vsub.f32 %v274_v40, %v6748_v30  ;;  %v270_v40 = vld [vmem:[%s7417_s1 + $0x3c0] sm:$0xff] }
 0x13d   : > { %4401 = vmatpush3.msra.mxu1 %v7973_v42  ;;  %4375 = vmatprep.subr.mxu0 %v8010_v51  ;;  %v7629_v42 = vand.u32 4294901760, %v6726_v35  ;;  %v6789_v63 = vand.u32 4294901760, %v256_v16  ;;  %8029 = vst [vmem:[#allocation18_spill] sm:$0xff] %v6852_v56  ;;  %v8030_v51 = vld [vmem:[#allocation22_spill] sm:$0xff]  ;;  %v7630_v9 = vand.u32 4294901760, %v6826_v62 }
 0x13e   : > { %4402 = vmatprep.subr.mxu1 %v7974_v59  ;;  %4376 = vmatpush3.msra.mxu0 %v8011_v46  ;;  %v7628_v59 = vand.u32 4294901760, %v6732_v12  ;;  %8015 = vst [vmem:[#allocation10_spill] sm:$0xff] %v6786_v15  ;;  %v6832_v27 = vsub.f32 %v257_v14, %v6786_v15  ;;  %v7624_v22 = vand.u32 4294901760, %v6800_v24  ;;  %v7627_v14 = vand.u32 4294901760, %v6795_v1  ;;  %v8031_v46 = vld [vmem:[#allocation30_spill] sm:$0xff] }
 0x13f   : > { %4403 = vmatpush3.msra.mxu1 %v7975_v45  ;;  %4377 = vmatprep.subr.mxu0 %v8013_v58  ;;  %v7626_v45 = vand.u32 4294901760, %v6743_v2  ;;  %8016 = vst [vmem:[#allocation16_spill] sm:$0xff] %v6789_v63  ;;  %v6808_v48 = vsub.f32 %v6726_v35, %v7629_v42  ;;  %v6840_v25 = vsub.f32 %v256_v16, %v6789_v63  ;;  %v149_v58 = vld [vmem:[%s5061_s25 + $0x38] sm:$0xff] }
 0x140   : > { %4404 = vmatprep.subr.mxu1 %v8014_v26  ;;  %4378 = vmatpush3.msra.mxu0 %v8017_v13  ;;  %v6823_v49 = vsub.f32 %v6732_v12, %v7628_v59  ;;  %v6857_v16 = vsub.f32 %v272_v11, %v6797_v23  ;;  %v6870_v13 = vsub.f32 %v6769_v53, %v7623_v39  ;;  %v7631_v54 = vand.u32 4294901760, %v6832_v27 }
 0x141   : > { %4405 = vmatpush3.msra.mxu1 %v7976_v4  ;;  %4379 = vmatprep.subr.mxu0 %v8019_v21  ;;  %v7625_v4 = vand.u32 4294901760, %v6762_v10  ;;  %v6837_v38 = vsub.f32 %v6743_v2, %v7626_v45  ;;  %v6873_v21 = vsub.f32 %v271_v44, %v6811_v18  ;;  %v6892_v44 = vsub.f32 %v6784_v31, %v7622_v60 }
 0x142   : > { %4406 = vmatprep.subr.mxu1 %v8020_v6  ;;  %4380 = vmatpush3.msra.mxu0 %v8022_v43  ;;  %v6878_v6 = vand.u32 4294901760, %v270_v40  ;;  %v6912_v60 = vsub.f32 %v6795_v1, %v7627_v14  ;;  %v7633_v39 = vand.u32 4294901760, %v6857_v16  ;;  %v8045_v11 = vand.u32 4294901760, %v6823_v49 }
 0x143   : > { %4407 = vmatpush3.msra.mxu1 %v8023_v57  ;;  %4381 = vmatprep.subr.mxu0 %v8025_v52  ;;  %v6865_v26 = vsub.f32 %v6762_v10, %v7625_v4  ;;  %v269_v57 = vld [vmem:[%s7417_s1 + $0x3b8] sm:$0xff]  ;;  %v7634_v45 = vand.u32 4294901760, %v6873_v21  ;;  %v8048_v49 = vand.u32 4294901760, %v6837_v38 }
 0x144   : > { %4408 = vmatprep.subr.mxu1 %v6352_v34  ;;  %v254_v34 = vld [vmem:[%s7417_s1 + $0x340] sm:$0xff]  ;;  %4382 = vmatpush3.msra.mxu0 %v8027_v28  ;;  %8032 = vst [vmem:[#allocation13_spill] sm:$0xff] %v6878_v6  ;;  %v253_v52 = vld [vmem:[%s7417_s1 + $0x338] sm:$0xff]  ;;  %v7632_v28 = vand.u32 4294901760, %v6840_v25  ;;  %v6922_v4 = vand.u32 4294901760, %v269_v57  ;;  %v6944_v42 = vsub.f32 %v270_v40, %v6878_v6 }
 0x145   : > { %2753 = vmatprep.mubr.f32.mxu0 %v8028_v0  ;;  %4409 = vmatpush3.msra.mxu1 %v8030_v51  ;;  %v6880_v43 = vand.u32 4294901760, %v254_v34  ;;  %v6907_v51 = vsub.f32 %v6800_v24, %v7624_v22  ;;  %v6935_v59 = vand.u32 4294901760, %v253_v52 }
 0x146   : > { %2755 = vmatmul.mubr.f32.vlgmr.msra.gmra.mxu0 %v8031_v46  ;;  %4410 = vmatprep.subr.mxu1 %v6409_v33  ;;  %8035 = vst [vmem:[#allocation6_spill] sm:$0xff] %v6922_v4  ;;  %8038 = vst [vmem:[#allocation8_spill] sm:$0xff] %v6944_v42  ;;  %v6959_v33 = vsub.f32 %v6840_v25, %v7632_v28  ;;  %v8049_v38 = vand.u32 4294901760, %v6944_v42 }
 0x147   : > { %4421 = vmatprep.subr.mxu0 %v6688_v3  ;;  %8033 = vst [vmem:[#allocation19_spill] sm:$0xff] %v6880_v43  ;;  %4411 = vmatpush3.msra.mxu1 %v6384_v55  ;;  %v6902_v55 = vsub.f32 %v255_v19, %v6852_v56  ;;  %v2988_v19 = vand.u32 4294901760, %v6865_v26  ;;  %v6928_v14 = vsub.f32 %v254_v34, %v6880_v43  ;;  %8037 = vst [vmem:[#allocation21_spill] sm:$0xff] %v6935_v59  ;;  %v268_v26 = vld [vmem:[%s7417_s1 + $0x3b0] sm:$0xff] }
 0x148   : > { %4422 = vmatpush3.msra.mxu0 %v6693_v32  ;;  %4412 = vmatprep.subr.mxu1 %v7981_v29  ;;  %v252_v29 = vld [vmem:[%s7417_s1 + $0x330] sm:$0xff]  ;;  %v2995_v34 = vand.u32 4294901760, %v6892_v44  ;;  %v6968_v44 = vsub.f32 %v6857_v16, %v7633_v39  ;;  %v266_v39 = vld [vmem:[%s7417_s1 + $0x3a0] sm:$0xff]  ;;  %v6998_v28 = vsub.f32 %v253_v52, %v6935_v59  ;;  %v249_v52 = vld [vmem:[%s7417_s1 + $0x318] sm:$0xff] }
 0x149   : > { %4423 = vmatprep.subr.mxu0 %v6704_v20  ;;  %8034 = vst [vmem:[#allocation20_spill] sm:$0xff] %v6902_v55  ;;  %4413 = vmatpush3.msra.mxu1 %v6421_v5  ;;  %8036 = vst [vmem:[#allocation5_spill] sm:$0xff] %v6928_v14  ;;  %v6933_v5 = vsub.f32 %v6826_v62, %v7630_v9  ;;  %v6952_v9 = vsub.f32 %v6832_v27, %v7631_v54  ;;  %v6954_v22 = vand.u32 4294901760, %v252_v29  ;;  %v267_v54 = vld [vmem:[%s7417_s1 + $0x3a8] sm:$0xff] }
 0x14a   : > { %4424 = vmatpush3.msra.mxu0 %v6715_v17  ;;  %4414 = vmatprep.subr.mxu1 %v6446_v7  ;;  %v251_v7 = vld [vmem:[%s7417_s1 + $0x328] sm:$0xff] }
 0x14b   : > { %4425 = vmatprep.subr.mxu0 %v6717_v36  ;;  %4415 = vmatpush3.msra.mxu1 %v6462_v61  ;;  %8039 = vst [vmem:[#allocation11_spill] sm:$0xff] %v6954_v22  ;;  %v3114_v61 = vand.u32 4294901760, %v6907_v51  ;;  %v6981_v51 = vsub.f32 %v6873_v21, %v7634_v45  ;;  %v6983_v40 = vand.u32 4294901760, %v251_v7  ;;  %v3121_v45 = vand.u32 4294901760, %v6933_v5 }
 0x14c   : > { %4426 = vmatpush3.msra.mxu0 %v6737_v37  ;;  %4416 = vmatprep.subr.mxu1 %v6480_v47  ;;  %v6976_v47 = vand.u32 4294901760, %v268_v26  ;;  %v7010_v5 = vand.u32 4294901760, %v267_v54  ;;  %v148_v37 = vld [vmem:[%s5061_s25 + $0x30] sm:$0xff] }
 0x14d   : > { %4427 = vmatprep.subr.mxu0 %v6748_v30  ;;  %4417 = vmatpush3.msra.mxu1 %v6482_v41  ;;  %8041 = vst [vmem:[#allocation17_spill] sm:$0xff] %v6983_v40  ;;  %v250_v41 = vld [vmem:[%s7417_s1 + $0x320] sm:$0xff]  ;;  %v8042_v30 = vand.u32 4294901760, %v6808_v48  ;;  %v8046_v48 = vand.u32 4294901760, %v6902_v55 }
 0x14e   : > { %2857 = vmatprep.mubr.f32.mxu1 %v8028_v0  ;;  %8040 = vst [vmem:[#allocation9_spill] sm:$0xff] %v6976_v47  ;;  %v6992_v0 = vsub.f32 %v269_v57, %v6922_v4  ;;  %4428 = vmatpush3.msra.mxu0 %v6750_v50  ;;  %v3009_v57 = vand.u32 4294901760, %v6952_v9  ;;  %v7007_v50 = vsub.f32 %v252_v29, %v6954_v22  ;;  %8044 = vst [vmem:[#allocation24_spill] sm:$0xff] %v7010_v5 }
 0x14f   : > { %2859 = vmatmul.mubr.f32.vlgmr.msra.gmra.mxu1 %v8031_v46  ;;  %4429 = vmatprep.subr.mxu0 %v6774_v8  ;;  %v7023_v9 = vsub.f32 %v6902_v55, %v8046_v48  ;;  %v7025_v29 = vand.u32 4294901760, %v266_v39  ;;  %v7027_v46 = vand.u32 4294901760, %v250_v41  ;;  %v248_v8 = vld [vmem:[%s7417_s1 + $0x310] sm:$0xff]  ;;  %v265_v48 = vld [vmem:[%s7417_s1 + $0x398] sm:$0xff]  ;;  %v7045_v55 = vsub.f32 %v268_v26, %v6976_v47 }
 0x150   : > { %4456 = vmatprep.subr.mxu1 %v8042_v30  ;;  %8043 = vst [vmem:[#allocation29_spill] sm:$0xff] %v7007_v50  ;;  %4430 = vmatpush3.msra.mxu0 %v6786_v15  ;;  %v3128_v30 = vand.u32 4294901760, %v6968_v44  ;;  %v7038_v44 = vsub.f32 %v251_v7, %v6983_v40  ;;  %v8050_v7 = vand.u32 4294901760, %v6928_v14  ;;  %v264_v26 = vld [vmem:[%s7417_s1 + $0x390] sm:$0xff]  ;;  %v7063_v15 = vand.u32 4294901760, %v149_v58 }
 0x151   : > { %4457 = vmatpush3.msra.mxu1 %v8045_v11  ;;  %8047 = vst [vmem:[#allocation28_spill] sm:$0xff] %v7027_v46  ;;  %4431 = vmatprep.subr.mxu0 %v6797_v23  ;;  %v7058_v23 = vand.u32 4294901760, %v249_v52  ;;  %v7079_v36 = vsub.f32 %v250_v41, %v7027_v46  ;;  %v263_v41 = vld [vmem:[%s7417_s1 + $0x388] sm:$0xff] }
 0x152   : > { %4458 = vmatprep.subr.mxu1 %v8048_v49  ;;  %4432 = vmatpush3.msra.mxu0 %v6789_v63  ;;  %v7051_v49 = vsub.f32 %v6944_v42, %v8049_v38  ;;  %v7056_v11 = vsub.f32 %v6928_v14, %v8050_v7  ;;  %8051 = vst [vmem:[#allocation23_spill] sm:$0xff] %v7063_v15  ;;  %v7069_v63 = vand.u32 4294901760, %v248_v8  ;;  %v7074_v14 = vand.u32 4294901760, %v148_v37 }
 0x153   : > { %4459 = vmatpush3.msra.mxu1 %v2988_v19  ;;  %4433 = vmatprep.subr.mxu0 %v6811_v18  ;;  %v8052_v19 = vand.u32 4294901760, %v6870_v13  ;;  %v7072_v7 = vsub.f32 %v267_v54, %v7010_v5  ;;  %v3023_v42 = vand.u32 4294901760, %v7023_v9  ;;  %8054 = vst [vmem:[#allocation26_spill] sm:$0xff] %v7079_v36  ;;  %v7081_v18 = vand.u32 4294901760, %v265_v48 }
 0x154   : > { %8053 = vst [vmem:[#allocation25_spill] sm:$0xff] %v7074_v14  ;;  %4434 = vmatpush3.msra.mxu0 %v6852_v56  ;;  %v8055_v54 = vand.u32 4294901760, %v6992_v0  ;;  %v7090_v38 = vand.u32 4294901760, %v264_v26  ;;  %v7097_v9 = vsub.f32 %v266_v39, %v7025_v29  ;;  %v3142_v13 = vand.u32 4294901760, %v7051_v49  ;;  %3201 = vmatprep.mubr.f32.mxu1 %v7063_v15 }
 0x155   : > { %4460 = vmatprep.subr.mxu1 %v8052_v19  ;;  %4435 = vmatprep.subr.mxu0 %v6878_v6  ;;  %v7105_v6 = vsub.f32 %v249_v52, %v7058_v23  ;;  %v7111_v56 = vsub.f32 %v149_v58, %v7063_v15  ;;  %v8058_v39 = vand.u32 4294901760, %v6998_v28  ;;  %v7118_v49 = vsub.f32 %v248_v8, %v7069_v63  ;;  %v246_v58 = vld [vmem:[%s7417_s1 + $0x300] sm:$0xff]  ;;  %v8095_v15 = vld [vmem:[#allocation11_spill] sm:$0xff] }
 0x156   : > { %4461 = vmatpush3.msra.mxu1 %v2995_v34  ;;  %v7088_v19 = vsub.f32 %v6992_v0, %v8055_v54  ;;  %8056 = vst [vmem:[#allocation14_spill] sm:$0xff] %v7090_v38  ;;  %4436 = vmatpush3.msra.mxu0 %v6880_v43  ;;  %v3030_v54 = vand.u32 4294901760, %v7056_v11  ;;  %v247_v34 = vld [vmem:[%s7417_s1 + $0x308] sm:$0xff]  ;;  %v262_v11 = vld [vmem:[%s7417_s1 + $0x380] sm:$0xff]  ;;  %v8060_v43 = vand.u32 4294901760, %v7045_v55  ;;  %v8061_v52 = vand.u32 4294901760, %v6959_v33 }
 0x157   : > { %4462 = vmatprep.subr.mxu1 %v3114_v61  ;;  %v8057_v61 = vand.u32 4294901760, %v6912_v60  ;;  %4437 = vmatprep.subr.mxu0 %v6922_v4  ;;  %v3036_v60 = vsub.f32 %v6998_v28, %v8058_v39  ;;  %v7134_v39 = vand.u32 4294901760, %v263_v41  ;;  %v7138_v4 = vsub.f32 %v265_v48, %v7081_v18 }
 0x158   : > { %4438 = vmatpush3.msra.mxu0 %v6935_v59  ;;  %v7145_v59 = vand.u32 4294901760, %v247_v34  ;;  %v7151_v48 = vand.u32 4294901760, %v262_v11 }
 0x159   : > { %4463 = vmatpush3.msra.mxu1 %v8057_v61  ;;  %v7128_v61 = vsub.f32 %v148_v37, %v7074_v14  ;;  %4439 = vmatprep.subr.mxu0 %v6976_v47  ;;  %v3149_v37 = vand.u32 4294901760, %v7088_v19  ;;  %v7157_v19 = vsub.f32 %v264_v26, %v7090_v38  ;;  %v8064_v26 = vand.u32 4294901760, %v7038_v44 }
 0x15a   : > { %4464 = vmatprep.subr.mxu1 %v3121_v45  ;;  %v8059_v45 = vand.u32 4294901760, %v7007_v50  ;;  %4440 = vmatpush3.msra.mxu0 %v6954_v22  ;;  %v8063_v22 = vand.u32 4294901760, %v7072_v7  ;;  %v8065_v47 = vand.u32 4294901760, %v7097_v9 }
 0x15b   : > { %4465 = vmatpush3.msra.mxu1 %v3009_v57  ;;  %v3155_v57 = vsub.f32 %v7045_v55, %v8060_v43  ;;  %4441 = vmatprep.subr.mxu0 %v7010_v5  ;;  %v8062_v43 = vand.u32 4294901760, %v6981_v51  ;;  %v3050_v5 = vsub.f32 %v7038_v44, %v8064_v26 }
 0x15c   : > { %v3043_v8 = vsub.f32 %v7007_v50, %v8059_v45  ;;  %4466 = vmatprep.subr.mxu1 %v3128_v30  ;;  %v7153_v50 = vand.u32 4294901760, %v246_v58  ;;  %v3037_v45 = vand.u32 4294901760, %v3036_v60  ;;  %v3162_v33 = vsub.f32 %v7072_v7, %v8063_v22  ;;  %4442 = vmatpush3.msra.mxu0 %v6983_v40 }
 0x15d   : > { %4467 = vmatpush3.msra.mxu1 %v8061_v52  ;;  %v7677_v52 = vand.u32 4294901760, %v7079_v36  ;;  %v7173_v60 = vsub.f32 %v263_v41, %v7134_v39  ;;  %4443 = vmatprep.subr.mxu0 %v7025_v29  ;;  %v3156_v22 = vand.u32 4294901760, %v3155_v57  ;;  %v8067_v41 = vand.u32 4294901760, %v7111_v56 }
 0x15e   : > { %4468 = vmatprep.subr.mxu1 %v8062_v43  ;;  %v3044_v30 = vand.u32 4294901760, %v3043_v8  ;;  %v7177_v43 = vsub.f32 %v247_v34, %v7145_v59  ;;  %4444 = vmatpush3.msra.mxu0 %v7027_v46  ;;  %v7185_v26 = vsub.f32 %v246_v58, %v7153_v50  ;;  %v7192_v34 = vsub.f32 %v262_v11, %v7151_v48 }
 0x15f   : > { %4469 = vmatpush3.msra.mxu1 %v3023_v42  ;;  %v3169_v42 = vsub.f32 %v7097_v9, %v8065_v47  ;;  %4445 = vmatprep.subr.mxu0 %v7081_v18  ;;  %v3163_v47 = vand.u32 4294901760, %v3162_v33  ;;  %v8069_v58 = vand.u32 4294901760, %v7128_v61  ;;  %v8070_v11 = vand.u32 4294901760, %v7138_v4 }
 0x160   : > { %4470 = vmatprep.subr.mxu1 %v3142_v13  ;;  %8066 = vst [vmem:[#allocation22_spill] sm:$0xff] %v7185_v26  ;;  %v2963_v13 = vsub.f32 %v7111_v56, %v8067_v41  ;;  %8068 = vst [vmem:[#allocation30_spill] sm:$0xff] %v7192_v34  ;;  %4446 = vmatpush3.msra.mxu0 %v7058_v23  ;;  %v3051_v41 = vand.u32 4294901760, %v3050_v5  ;;  %v7680_v51 = vand.u32 4294901760, %v7185_v26 }
 0x161   : > { %4471 = vmatpush3.msra.mxu1 %v3030_v54  ;;  %v3057_v54 = vsub.f32 %v7079_v36, %v7677_v52  ;;  %v2969_v8 = vsub.f32 %v7128_v61, %v8069_v58  ;;  %v3176_v57 = vsub.f32 %v7138_v4, %v8070_v11  ;;  %4447 = vmatprep.subr.mxu0 %v7090_v38  ;;  %v3170_v33 = vand.u32 4294901760, %v3169_v42 }
 0x162   : > { %4472 = vmatprep.subr.mxu1 %v3149_v37  ;;  %v8071_v52 = vand.u32 4294901760, %v7105_v6  ;;  %4448 = vmatpush3.msra.mxu0 %v7069_v63  ;;  %v2964_v5 = vand.u32 4294901760, %v2963_v13  ;;  %v7681_v37 = vand.u32 4294901760, %v7192_v34  ;;  %v8073_v38 = vand.u32 4294901760, %v7118_v49 }
 0x163   : > { %4473 = vmatpush3.msra.mxu1 %v3037_v45  ;;  %v8072_v45 = vand.u32 4294901760, %v7157_v19  ;;  %4449 = vmatprep.subr.mxu0 %v7134_v39  ;;  %v2970_v42 = vand.u32 4294901760, %v2969_v8  ;;  %v8074_v13 = vand.u32 4294901760, %v7173_v60  ;;  %v8075_v8 = vand.u32 4294901760, %v7177_v43 }
 0x164   : > { %4474 = vmatprep.subr.mxu1 %v3156_v22  ;;  %v3064_v58 = vsub.f32 %v7105_v6, %v8071_v52  ;;  %v3058_v22 = vand.u32 4294901760, %v3057_v54  ;;  %v3071_v52 = vsub.f32 %v7118_v49, %v8073_v38  ;;  %4450 = vmatpush3.msra.mxu0 %v7145_v59 }
 0x165   : > { %4475 = vmatpush3.msra.mxu1 %v3044_v30  ;;  %v3183_v11 = vsub.f32 %v7157_v19, %v8072_v45  ;;  %v3177_v30 = vand.u32 4294901760, %v3176_v57  ;;  %v3190_v45 = vsub.f32 %v7173_v60, %v8074_v13  ;;  %4451 = vmatprep.subr.mxu0 %v7151_v48  ;;  %v3078_v54 = vsub.f32 %v7177_v43, %v8075_v8  ;;  %v8079_v13 = vld [vmem:[#allocation8_spill] sm:$0xff] }
 0x166   : > { %4476 = vmatprep.subr.mxu1 %v3163_v47  ;;  %v3065_v47 = vand.u32 4294901760, %v3064_v58  ;;  %4452 = vmatpush3.msra.mxu0 %v7153_v50  ;;  %v3197_v57 = vsub.f32 %v7192_v34, %v7681_v37  ;;  %v8082_v8 = vld [vmem:[#allocation12_spill] sm:$0xff]  ;;  %v8093_v37 = vld [vmem:[#allocation21_spill] sm:$0xff] }
 0x167   : > { %4477 = vmatpush3.msra.mxu1 %v3051_v41  ;;  %2965 = vmatprep.mubr.f32.mxu0 %v2964_v5  ;;  %v3184_v38 = vand.u32 4294901760, %v3183_v11  ;;  %v3072_v41 = vand.u32 4294901760, %v3071_v52  ;;  %v3191_v58 = vand.u32 4294901760, %v3190_v45  ;;  %v3079_v5 = vand.u32 4294901760, %v3078_v54  ;;  %v8077_v52 = vld [vmem:[#allocation20_spill] sm:$0xff]  ;;  %v8080_v45 = vld [vmem:[#allocation3_spill] sm:$0xff] }
 0x168   : > { %4478 = vmatprep.subr.mxu1 %v3170_v33  ;;  %2971 = vmatmul.mubr.f32.vlgmr.msra.gmra.mxu0 %v2970_v42  ;;  %v3085_v33 = vsub.f32 %v7185_v26, %v7680_v51  ;;  %v3198_v11 = vand.u32 4294901760, %v3197_v57  ;;  %v8076_v42 = vld [vmem:[#allocation27_spill] sm:$0xff]  ;;  %v8083_v54 = vld [vmem:[#allocation2_spill] sm:$0xff] }
 0x169   : > { %4479 = vmatpush3.msra.mxu1 %v3058_v22  ;;  %4491 = vmatprep.subr.mxu0 %v6726_v35  ;;  %v8085_v57 = vld [vmem:[#allocation15_spill] sm:$0xff]  ;;  %v8092_v51 = vld [vmem:[#allocation6_spill] sm:$0xff] }
 0x16a   : > { %4480 = vmatprep.subr.mxu1 %v3177_v30  ;;  %4492 = vmatpush3.msra.mxu0 %v6732_v12  ;;  %v3086_v22 = vand.u32 4294901760, %v3085_v33  ;;  %v8078_v30 = vld [vmem:[#allocation7_spill] sm:$0xff]  ;;  %v8087_v33 = vld [vmem:[#allocation16_spill] sm:$0xff] }
 0x16b   : > { %4481 = vmatpush3.msra.mxu1 %v3065_v47  ;;  %4493 = vmatprep.subr.mxu0 %v6743_v2  ;;  %v8081_v47 = vld [vmem:[#allocation5_spill] sm:$0xff] }
 0x16c   : > { %4482 = vmatprep.subr.mxu1 %v3184_v38  ;;  %4494 = vmatpush3.msra.mxu0 %v6762_v10  ;;  %v8084_v38 = vld [vmem:[#allocation10_spill] sm:$0xff] }
 0x16d   : > { %4483 = vmatpush3.msra.mxu1 %v3072_v41  ;;  %4495 = vmatprep.subr.mxu0 %v6769_v53  ;;  %v8086_v41 = vld [vmem:[#allocation29_spill] sm:$0xff] }
 0x16e   : > { %4484 = vmatprep.subr.mxu1 %v3191_v58  ;;  %4496 = vmatpush3.msra.mxu0 %v6784_v31  ;;  %v8088_v58 = vld [vmem:[#allocation4_spill] sm:$0xff] }
 0x16f   : > { %4485 = vmatpush3.msra.mxu1 %v3079_v5  ;;  %4497 = vmatprep.subr.mxu0 %v6800_v24  ;;  %v8089_v5 = vld [vmem:[#allocation18_spill] sm:$0xff] }
 0x170   : > { %4486 = vmatprep.subr.mxu1 %v3198_v11  ;;  %4498 = vmatpush3.msra.mxu0 %v6795_v1  ;;  %v8090_v11 = vld [vmem:[#allocation13_spill] sm:$0xff] }
 0x171   : > { %4487 = vmatpush3.msra.mxu1 %v3086_v22  ;;  %4499 = vmatprep.subr.mxu0 %v6826_v62  ;;  %v8091_v22 = vld [vmem:[#allocation19_spill] sm:$0xff] }
 0x172   : > { %3203 = vmatmul.mubr.f32.vlgmr.msra.gmra.mxu1 %v7074_v14  ;;  %4526 = vmatprep.subr.mxu1 %v6688_v3  ;;  %v8094_v14 = vld [vmem:[#allocation9_spill] sm:$0xff] }
 0x173   : > { %4500 = vmatpush3.msra.mxu0 %v6832_v27  ;;  %4527 = vmatpush3.msra.mxu1 %v6693_v32 }
 0x174   : > { %4501 = vmatprep.subr.mxu0 %v6857_v16  ;;  %4528 = vmatprep.subr.mxu1 %v6704_v20 }
 0x175   : > { %4502 = vmatpush3.msra.mxu0 %v6840_v25  ;;  %4529 = vmatpush3.msra.mxu1 %v6715_v17 }
 0x176   : > { %4503 = vmatprep.subr.mxu0 %v6873_v21  ;;  %4530 = vmatprep.subr.mxu1 %v8076_v42 }
 0x177   : > { %4504 = vmatpush3.msra.mxu0 %v8077_v52  ;;  %4531 = vmatpush3.msra.mxu1 %v8078_v30 }
 0x178   : > { %4505 = vmatprep.subr.mxu0 %v8079_v13  ;;  %4532 = vmatprep.subr.mxu1 %v8080_v45 }
 0x179   : > { %4506 = vmatpush3.msra.mxu0 %v8081_v47  ;;  %4533 = vmatpush3.msra.mxu1 %v8082_v8 }
 0x17a   : > { %4507 = vmatprep.subr.mxu0 %v6992_v0  ;;  %4534 = vmatprep.subr.mxu1 %v8083_v54 }
 0x17b   : > { %4508 = vmatpush3.msra.mxu0 %v6998_v28  ;;  %4535 = vmatpush3.msra.mxu1 %v8084_v38 }
 0x17c   : > { %4509 = vmatprep.subr.mxu0 %v7045_v55  ;;  %4536 = vmatprep.subr.mxu1 %v8085_v57 }
 0x17d   : > { %4510 = vmatpush3.msra.mxu0 %v8086_v41  ;;  %4537 = vmatpush3.msra.mxu1 %v8087_v33 }
 0x17e   : > { %4511 = vmatprep.subr.mxu0 %v7072_v7  ;;  %4538 = vmatprep.subr.mxu1 %v8088_v58 }
 0x17f   : > { %4512 = vmatpush3.msra.mxu0 %v7038_v44  ;;  %4539 = vmatpush3.msra.mxu1 %v8089_v5 }
 0x180   : > { %4513 = vmatprep.subr.mxu0 %v7097_v9  ;;  %4540 = vmatprep.subr.mxu1 %v8090_v11 }
 0x181   : > { %4514 = vmatpush3.msra.mxu0 %v7079_v36  ;;  %4541 = vmatpush3.msra.mxu1 %v8091_v22  ;;  %v8096_v36 = vld [vmem:[#allocation24_spill] sm:$0xff] }
 0x182   : > { %4515 = vmatprep.subr.mxu0 %v7138_v4  ;;  %4542 = vmatprep.subr.mxu1 %v8092_v51 }
 0x183   : > { %4516 = vmatpush3.msra.mxu0 %v7105_v6  ;;  %4543 = vmatpush3.msra.mxu1 %v8093_v37 }
 0x184   : > { %4517 = vmatprep.subr.mxu0 %v7157_v19  ;;  %4544 = vmatprep.subr.mxu1 %v8094_v14 }
 0x185   : > { %4518 = vmatpush3.msra.mxu0 %v7118_v49  ;;  %4545 = vmatpush3.msra.mxu1 %v8095_v15 }
 0x186   : > { %4519 = vmatprep.subr.mxu0 %v7173_v60  ;;  %4546 = vmatprep.subr.mxu1 %v8096_v36  ;;  %v8097_v36 = vand.u32 4294901760, %v6726_v35  ;;  %v8102_v35 = vand.u32 4294901760, %v6769_v53  ;;  %v8107_v53 = vand.u32 4294901760, %v7128_v61 }
 0x187   : > { %4520 = vmatpush3.msra.mxu0 %v7177_v43  ;;  %4547 = vmatpush3.msra.mxu1 %v6983_v40  ;;  %v8098_v40 = vand.u32 4294901760, %v6732_v12  ;;  %v8104_v12 = vand.u32 4294901760, %v6800_v24  ;;  %v8110_v24 = vand.u32 4294901760, %v6857_v16  ;;  %v8120_v16 = vand.u32 4294901760, %v7072_v7 }
 0x188   : > { %4521 = vmatprep.subr.mxu0 %v7192_v34  ;;  %4548 = vmatprep.subr.mxu1 %v7025_v29  ;;  %v8099_v34 = vld [vmem:[#allocation14_spill] sm:$0xff]  ;;  %v8127_v7 = vand.u32 4294901760, %v7157_v19 }
 0x189   : > { %4522 = vmatpush3.msra.mxu0 %v7185_v26  ;;  %3338 = vmatprep.mubr.f32.mxu0 %v7111_v56  ;;  %v8100_v26 = vand.u32 4294901760, %v6743_v2  ;;  %v8105_v2 = vand.u32 4294901760, %v7111_v56  ;;  %v8119_v56 = vand.u32 4294901760, %v8086_v41 }
 0x18a   : > { %4549 = vmatpush3.msra.mxu1 %v7027_v46  ;;  %3341 = vmatmul.mubr.f32.vlgmr.msra.gmra.mxu0 %v7128_v61  ;;  %v8101_v46 = vand.u32 4294901760, %v6762_v10  ;;  %v8106_v10 = vand.u32 4294901760, %v6795_v1  ;;  %v8111_v1 = vand.u32 4294901760, %v6840_v25  ;;  %v8118_v25 = vand.u32 4294901760, %v7045_v55  ;;  %v8123_v55 = vld [vmem:[#allocation26_spill] sm:$0xff]  ;;  %v8130_v61 = vld [vmem:[#allocation24_spill] sm:$0xff] }
 0x18b   : > { %4550 = vmatprep.subr.mxu1 %v7081_v18  ;;  %4561 = vmatprep.subr.mxu0 %v8097_v36  ;;  %v8103_v36 = vand.u32 4294901760, %v6784_v31  ;;  %v8109_v31 = vand.u32 4294901760, %v6832_v27  ;;  %v8117_v27 = vand.u32 4294901760, %v6998_v28  ;;  %v8122_v28 = vand.u32 4294901760, %v7097_v9 }
 0x18c   : > { %4551 = vmatpush3.msra.mxu1 %v7058_v23  ;;  %4562 = vmatpush3.msra.mxu0 %v8098_v40  ;;  %v8108_v40 = vand.u32 4294901760, %v6826_v62  ;;  %v8112_v62 = vand.u32 4294901760, %v6873_v21  ;;  %v8121_v21 = vand.u32 4294901760, %v7038_v44  ;;  %v8126_v44 = vand.u32 4294901760, %v7105_v6 }
 0x18d   : > { %4552 = vmatprep.subr.mxu1 %v8099_v34  ;;  %4563 = vmatprep.subr.mxu0 %v8100_v26  ;;  %v8128_v9 = vand.u32 4294901760, %v7118_v49  ;;  %v8131_v6 = vand.u32 4294901760, %v7177_v43  ;;  %v8133_v26 = vld [vmem:[#allocation30_spill] sm:$0xff]  ;;  %v3858_v43 = vpop.f32.mrf.mxu1 }
 0x18e   : > { %4553 = vmatpush3.msra.mxu1 %v7069_v63  ;;  %4564 = vmatpush3.msra.mxu0 %v8101_v46  ;;  %v8125_v46 = vand.u32 4294901760, %v7138_v4  ;;  %v8129_v4 = vand.u32 4294901760, %v7173_v60  ;;  %v8134_v19 = vand.u32 4294901760, %v8133_v26  ;;  %v8139_v60 = vld [vmem:[#allocation25_spill] sm:$0xff] }
 0x18f   : > { %4554 = vmatprep.subr.mxu1 %v7134_v39  ;;  %4565 = vmatprep.subr.mxu0 %v8102_v35 }
 0x190   : > { %4555 = vmatpush3.msra.mxu1 %v7145_v59  ;;  %4566 = vmatpush3.msra.mxu0 %v8103_v36 }
 0x191   : > { %4556 = vmatprep.subr.mxu1 %v7151_v48  ;;  %4567 = vmatprep.subr.mxu0 %v8104_v12 }
 0x192   : > { %4557 = vmatpush3.msra.mxu1 %v7153_v50  ;;  %3445 = vmatprep.mubr.f32.mxu1 %v8105_v2 }
 0x193   : > { %4568 = vmatpush3.msra.mxu0 %v8106_v10  ;;  %3449 = vmatmul.mubr.f32.vlgmr.msra.gmra.mxu1 %v8107_v53 }
 0x194   : > { %4569 = vmatprep.subr.mxu0 %v8108_v40  ;;  %4596 = vmatprep.subr.mxu1 %v6688_v3  ;;  %v8113_v3 = vand.u32 4294901760, %v8077_v52  ;;  %v3859_v52 = vpop.f32.mrf.mxu1 }
 0x195   : > { %4570 = vmatpush3.msra.mxu0 %v8109_v31  ;;  %4597 = vmatpush3.msra.mxu1 %v6693_v32  ;;  %v8114_v32 = vand.u32 4294901760, %v8079_v13  ;;  %v3860_v41 = vadd.f32 %v3859_v52, %v3858_v43 }
 0x196   : > { %4571 = vmatprep.subr.mxu0 %v8110_v24  ;;  %4598 = vmatprep.subr.mxu1 %v6704_v20  ;;  %v8115_v20 = vand.u32 4294901760, %v8081_v47 }
 0x197   : > { %4572 = vmatpush3.msra.mxu0 %v8111_v1  ;;  %4599 = vmatpush3.msra.mxu1 %v6715_v17  ;;  %v8116_v17 = vand.u32 4294901760, %v6992_v0  ;;  %v8124_v0 = vand.u32 4294901760, %v8123_v55 }
 0x198   : > { %4573 = vmatprep.subr.mxu0 %v8112_v62  ;;  %4600 = vmatprep.subr.mxu1 %v8076_v42 }
 0x199   : > { %4574 = vmatpush3.msra.mxu0 %v8113_v3  ;;  %4601 = vmatpush3.msra.mxu1 %v8078_v30  ;;  %v3928_v30 = vpop.f32.mrf.mxu1 }
 0x19a   : > { %4575 = vmatprep.subr.mxu0 %v8114_v32  ;;  %4602 = vmatprep.subr.mxu1 %v8080_v45 }
 0x19b   : > { %4576 = vmatpush3.msra.mxu0 %v8115_v20  ;;  %4603 = vmatpush3.msra.mxu1 %v8082_v8  ;;  %v3929_v13 = vpop.f32.mrf.mxu1 }
 0x19c   : > { %4577 = vmatprep.subr.mxu0 %v8116_v17  ;;  %4604 = vmatprep.subr.mxu1 %v8083_v54  ;;  %v3930_v36 = vadd.f32 %v3929_v13, %v3928_v30 }
 0x19d   : > { %4578 = vmatpush3.msra.mxu0 %v8117_v27  ;;  %4605 = vmatpush3.msra.mxu1 %v8084_v38  ;;  %v3998_v45 = vpop.f32.mrf.mxu1 }
 0x19e   : > { %4579 = vmatprep.subr.mxu0 %v8118_v25  ;;  %4606 = vmatprep.subr.mxu1 %v8085_v57 }
 0x19f   : > { %4580 = vmatpush3.msra.mxu0 %v8119_v56  ;;  %4607 = vmatpush3.msra.mxu1 %v8087_v33  ;;  %v3999_v47 = vpop.f32.mrf.mxu1 }
 0x1a0   : > { %4581 = vmatprep.subr.mxu0 %v8120_v16  ;;  %4608 = vmatprep.subr.mxu1 %v8088_v58  ;;  %v4000_v31 = vadd.f32 %v3999_v47, %v3998_v45 }
 0x1a1   : > { %4582 = vmatpush3.msra.mxu0 %v8121_v21  ;;  %4609 = vmatpush3.msra.mxu1 %v8089_v5  ;;  %v4068_v8 = vpop.f32.mrf.mxu1 }
 0x1a2   : > { %4583 = vmatprep.subr.mxu0 %v8122_v28  ;;  %4610 = vmatprep.subr.mxu1 %v8090_v11 }
 0x1a3   : > { %4584 = vmatpush3.msra.mxu0 %v8124_v0  ;;  %4611 = vmatpush3.msra.mxu1 %v8091_v22  ;;  %v4069_v54 = vpop.f32.mrf.mxu1 }
 0x1a4   : > { %4585 = vmatprep.subr.mxu0 %v8125_v46  ;;  %4612 = vmatprep.subr.mxu1 %v8092_v51  ;;  %v8132_v51 = vld [vmem:[#allocation17_spill] sm:$0xff]  ;;  %v4070_v17 = vadd.f32 %v4069_v54, %v4068_v8 }
 0x1a5   : > { %4586 = vmatpush3.msra.mxu0 %v8126_v44  ;;  %4613 = vmatpush3.msra.mxu1 %v8093_v37  ;;  %v8137_v37 = vld [vmem:[#allocation23_spill] sm:$0xff]  ;;  %v4138_v38 = vpop.f32.mrf.mxu1 }
 0x1a6   : > { %4587 = vmatprep.subr.mxu0 %v8127_v7  ;;  %4614 = vmatprep.subr.mxu1 %v8094_v14  ;;  %v8135_v14 = vld [vmem:[#allocation22_spill] sm:$0xff] }
 0x1a7   : > { %4588 = vmatpush3.msra.mxu0 %v8128_v9  ;;  %4615 = vmatpush3.msra.mxu1 %v8095_v15  ;;  %v8136_v49 = vand.u32 4294901760, %v8135_v14  ;;  %v8138_v15 = vld [vmem:[#allocation28_spill] sm:$0xff]  ;;  %v4139_v33 = vpop.f32.mrf.mxu1 }
 0x1a8   : > { %4589 = vmatprep.subr.mxu0 %v8129_v4  ;;  %4616 = vmatprep.subr.mxu1 %v8130_v61  ;;  %v4140_v55 = vadd.f32 %v4139_v33, %v4138_v38 }
 0x1a9   : > { %4590 = vmatpush3.msra.mxu0 %v8131_v6  ;;  %4617 = vmatpush3.msra.mxu1 %v8132_v51  ;;  %v4208_v22 = vpop.f32.mrf.mxu1 }
 0x1aa   : > { %4591 = vmatprep.subr.mxu0 %v8134_v19  ;;  %4618 = vmatprep.subr.mxu1 %v7025_v29  ;;  %v3823_v29 = vpop.f32.mrf.mxu0 }
 0x1ab   : > { %4592 = vmatpush3.msra.mxu0 %v8136_v49  ;;  %3615 = vmatprep.mubr.f32.mxu0 %v8137_v37  ;;  %v4209_v53 = vpop.f32.mrf.mxu1 }
 0x1ac   : > { %4619 = vmatpush3.msra.mxu1 %v8138_v15  ;;  %3617 = vmatmul.mubr.f32.vlgmr.msra.gmra.mxu0 %v8139_v60  ;;  %v4210_v4 = vadd.f32 %v4209_v53, %v4208_v22 }
 0x1ad   : > { %4620 = vmatprep.subr.mxu1 %v7081_v18  ;;  %3719 = vmatprep.mubr.f32.mxu1 %v8137_v37  ;;  %v3824_v18 = vpop.f32.mrf.mxu0 }
 0x1ae   : > { %4621 = vmatpush3.msra.mxu1 %v7058_v23  ;;  %v3825_v58 = vadd.f32 %v3824_v18, %v3823_v29 }
 0x1af   : > { %4622 = vmatprep.subr.mxu1 %v8099_v34  ;;  %v3893_v42 = vpop.f32.mrf.mxu0 }
 0x1b0   : > { %4623 = vmatpush3.msra.mxu1 %v7069_v63  ;;  %v619_v35 = vadd.f32 %v3860_v41, %v3825_v58 }
 0x1b1   : > { %4624 = vmatprep.subr.mxu1 %v7134_v39  ;;  %v3894_v23 = vpop.f32.mrf.mxu0 }
 0x1b2   : > { %4625 = vmatpush3.msra.mxu1 %v7145_v59  ;;  %v3895_v5 = vadd.f32 %v3894_v23, %v3893_v42 }
 0x1b3   : > { %4626 = vmatprep.subr.mxu1 %v7151_v48  ;;  %v3963_v34 = vpop.f32.mrf.mxu0 }
 0x1b4   : > { %4627 = vmatpush3.msra.mxu1 %v7153_v50  ;;  %v757_v2 = vadd.f32 %v3895_v5, %v619_v35 }
 0x1b5   : > { %3721 = vmatmul.mubr.f32.vlgmr.msra.gmra.mxu1 %v8139_v60  ;;  %v3964_v63 = vpop.f32.mrf.mxu0 }
 0x1b6   : > { %v3965_v10 = vadd.f32 %v3964_v63, %v3963_v34  ;;  %v865_v40 = vadd.f32 %v3930_v36, %v757_v2 }
 0x1b7   : > { %v4033_v39 = vpop.f32.mrf.mxu0 }
 0x1b8   : > { %v1033_v62 = vadd.f32 %v3965_v10, %v865_v40 }
 0x1b9   : > { %v4034_v59 = vpop.f32.mrf.mxu0 }
 0x1ba   : > { %v4035_v3 = vadd.f32 %v4034_v59, %v4033_v39  ;;  %v1137_v20 = vadd.f32 %v4000_v31, %v1033_v62 }
 0x1bb   : > { %v4103_v48 = vpop.f32.mrf.mxu0 }
 0x1bc   : > { %v1249_v25 = vadd.f32 %v4035_v3, %v1137_v20 }
 0x1bd   : > { %v4104_v50 = vpop.f32.mrf.mxu0 }
 0x1be   : > { %v4105_v56 = vadd.f32 %v4104_v50, %v4103_v48  ;;  %v1481_v28 = vadd.f32 %v4070_v17, %v1249_v25 }
 0x1bf   : > { %v4173_v57 = vpop.f32.mrf.mxu0 }
 0x1c0   : > { %v1619_v46 = vadd.f32 %v4105_v56, %v1481_v28 }
 0x1c1   : > { %v4174_v11 = vpop.f32.mrf.mxu0 }
 0x1c2   : > { %v4175_v44 = vadd.f32 %v4174_v11, %v4173_v57  ;;  %v1727_v9 = vadd.f32 %v4140_v55, %v1619_v46 }
 0x1c3   : > { %v4243_v12 = vpop.f32.mrf.mxu0 }
 0x1c4   : > { %v1895_v51 = vadd.f32 %v4175_v44, %v1727_v9 }
 0x1c5   : > { %v4244_v24 = vpop.f32.mrf.mxu0 }
 0x1c6   : > { %v4245_v26 = vadd.f32 %v4244_v24, %v4243_v12  ;;  %v1999_v14 = vadd.f32 %v4210_v4, %v1895_v51 }
 0x1c8   : > { %v2111_v15 = vadd.f32 %v4245_v26, %v1999_v14 }
 0x1cb   : > { %v4278_v1 = vpop.f32.mrf.mxu1 }
 0x1cd   : > { %v4279_v27 = vpop.f32.mrf.mxu1 }
 0x1ce   : > { %v4280_v49 = vadd.f32 %v4279_v27, %v4278_v1 }
 0x1d0   : > { %v2343_v43 = vadd.f32 %v4280_v49, %v2111_v15 }
 0x1e4   : > { %v4313_v32 = vpop.f32.mrf.mxu0 }
 0x1e6   : > { %v4314_v16 = vpop.f32.mrf.mxu0 }
 0x1e7   : > { %v4315_v60 = vadd.f32 %v4314_v16, %v4313_v32 }
 0x1e9   : > { %v2481_v23 = vadd.f32 %v4315_v60, %v2343_v43 }
 0x1ed   : > { %v4348_v21 = vpop.f32.mrf.mxu1 }
 0x1ef   : > { %v4349_v7 = vpop.f32.mrf.mxu1 }
 0x1f0   : > { %v4350_v42 = vadd.f32 %v4349_v7, %v4348_v21 }
 0x1f2   : > { %v2589_v13 = vadd.f32 %v4350_v42, %v2481_v23 }
 0x206   : > { %v4383_v0 = vpop.f32.mrf.mxu0 }
 0x208   : > { %v4384_v61 = vpop.f32.mrf.mxu0 }
 0x209   : > { %v4385_v30 = vadd.f32 %v4384_v61, %v4383_v0 }
 0x20b   : > { %v2757_v47 = vadd.f32 %v4385_v30, %v2589_v13 }
 0x20f   : > { %v4418_v6 = vpop.f32.mrf.mxu1 }
 0x211   : > { %v4419_v37 = vpop.f32.mrf.mxu1 }
 0x212   : > { %v4420_v63 = vadd.f32 %v4419_v37, %v4418_v6 }
 0x214   : > { %v2861_v48 = vadd.f32 %v4420_v63, %v2757_v47 }
 0x228   : > { %v4453_v19 = vpop.f32.mrf.mxu0 }
 0x22a   : > { %v4454_v29 = vpop.f32.mrf.mxu0 }
 0x22b   : > { %v4455_v59 = vadd.f32 %v4454_v29, %v4453_v19 }
 0x22d   : > { %v2973_v38 = vadd.f32 %v4455_v59, %v2861_v48 }
 0x232   : > { %v4488_v18 = vpop.f32.mrf.mxu1 }
 0x234   : > { %v4489_v34 = vpop.f32.mrf.mxu1 }
 0x235   : > { %v4490_v54 = vadd.f32 %v4489_v34, %v4488_v18 }
 0x237   : > { %v3205_v33 = vadd.f32 %v4490_v54, %v2973_v38 }
 0x24a   : > { %v4523_v52 = vpop.f32.mrf.mxu0 }
 0x24c   : > { %v4524_v45 = vpop.f32.mrf.mxu0 }
 0x24d   : > { %v4525_v57 = vadd.f32 %v4524_v45, %v4523_v52 }
 0x24f   : > { %v3343_v5 = vadd.f32 %v4525_v57, %v3205_v33 }
 0x253   : > { %v4558_v39 = vpop.f32.mrf.mxu1 }
 0x255   : > { %v4559_v50 = vpop.f32.mrf.mxu1 }
 0x256   : > { %v4560_v58 = vadd.f32 %v4559_v50, %v4558_v39 }
 0x258   : > { %v3451_v35 = vadd.f32 %v4560_v58, %v3343_v5 }
 0x26c   : > { %v4593_v8 = vpop.f32.mrf.mxu0 }
 0x26e   : > { %v4594_v41 = vpop.f32.mrf.mxu0 }
 0x26f   : > { %v4595_v11 = vadd.f32 %v4594_v41, %v4593_v8 }
 0x271   : > { %v3619_v12 = vadd.f32 %v4595_v11, %v3451_v35 }
 0x275   : > { %v4628_v22 = vpop.f32.mrf.mxu1 }
 0x277   : > { %v4629_v36 = vpop.f32.mrf.mxu1 }
 0x278   : > { %v4630_v2 = vadd.f32 %v4629_v36, %v4628_v22 }
 0x27a   : > { %v3723_v10 = vadd.f32 %v4630_v2, %v3619_v12 }
 0x27c   : > { %3726 = vst [vmem:[%s141_s21] sm:$0xff] %v3723_v10 }
 0x27d PF: > { %s12_s9 = sadd.s32 1, %s4645_s9  }
 0x27e   : > { %p9_p4 = scmp.ge.s32.totalorder %s12_s9, 4  }
 0x280   :  { %11 = sbr.rel (!%p9_p4) target bundleno = 1 (0x1), region = 58 }

</bundles_post_ra>
